<compile_context>
chip_gen: v7x
topology: tpu7x:2x2x1
jax: 0.10.0
libtpu: 0.0.40
codegen_flags: <defaults>
</compile_context>

<pallas_src>
import functools

import jax
import jax.numpy as jnp
from jax.experimental import pallas as pl
from jax.experimental.pallas import tpu as pltpu

C_IN, C_STEM, C_MID, C_SE, C_HEAD, NUM_CLASSES = 3, 16, 64, 4, 32, 5


def _silu(x):
    return x * jax.nn.sigmoid(x)


# --------------------------------------------------------------------------
# Fused kernel: one batch element per grid step, everything resident in VMEM.
# --------------------------------------------------------------------------
def _osda_fused_kernel(
    ee_ref, eo_ref, oe_ref, oo_ref,                 # stride-2 phase views
    stem_w_ref, stem_b_ref,
    exp_w_ref, exp_b_ref,
    dw_w_ref, dw_b_ref,
    se_w1_ref, se_b1_ref, se_w2_ref, se_b2_ref,
    proj_w_ref, proj_b_ref,
    head_w_ref, head_b_ref,
    cls_w_ref, cls_b_ref,
    out_ref,                                        # (1, 1, NUM_CLASSES)
    dw_pad_ref,                                     # VMEM scratch (Ho+2,Wo+2,C_MID)
    *, Ho, Wo,
):
    M = Ho * Wo

    # ---- stem: 3x3 / stride-2 conv (+ folded BN) + SiLU ----------------------
    # tap (kh,kw) of output (i,j) is phase[(kh%2, kw%2)][i + kh//2, j + kw//2]
    ee = ee_ref[0]
    eo = eo_ref[0]
    oe = oe_ref[0]
    oo = oo_ref[0]
    taps = (
        (ee, 0, 0), (eo, 0, 0), (ee, 0, 1),   # kh = 0
        (oe, 0, 0), (oo, 0, 0), (oe, 0, 1),   # kh = 1
        (ee, 1, 0), (eo, 1, 0), (ee, 1, 1),   # kh = 2
    )
    stem_w = stem_w_ref[...]                                  # [9, C_IN, C_STEM]
    acc = jnp.zeros((M, C_STEM), jnp.float32)
    for k, (src, di, dj) in enumerate(taps):
        tap = src[di:di + Ho, dj:dj + Wo, :].astype(jnp.float32).reshape(M, C_IN)
        acc = acc + jnp.dot(tap, stem_w[k], preferred_element_type=jnp.float32)
    h = _silu(acc + stem_b_ref[...])                          # [M, C_STEM] f32

    # ---- MBConv: expand 1x1 (+BN) + SiLU -------------------------------------
    e = jnp.dot(h.astype(jnp.bfloat16), exp_w_ref[...],
                preferred_element_type=jnp.float32) + exp_b_ref[...]
    e = _silu(e)                                              # [M, C_MID] f32

    # ---- depthwise 3x3 (+folded BN scale) + SiLU; halo handled in VMEM -------
    dw_pad_ref[...] = jnp.zeros_like(dw_pad_ref)
    dw_pad_ref[1:Ho + 1, 1:Wo + 1, :] = e.reshape(Ho, Wo, C_MID).astype(
        dw_pad_ref.dtype)
    dw_w = dw_w_ref[...]                                      # [9, C_MID] f32
    acc3 = jnp.zeros((Ho, Wo, C_MID), jnp.float32)
    for kh in range(3):
        for kw in range(3):
            tap = dw_pad_ref[kh:kh + Ho, kw:kw + Wo, :]
            acc3 = acc3 + tap * dw_w[kh * 3 + kw]
    y = _silu(acc3 + dw_b_ref[...])                           # [Ho, Wo, C_MID]
    y = y.reshape(M, C_MID)

    # ---- squeeze & excite ----------------------------------------------------
    pooled = jnp.sum(y, axis=0, keepdims=True) * (1.0 / float(M))   # [1, C_MID]
    se = _silu(jnp.dot(pooled, se_w1_ref[...],
                       preferred_element_type=jnp.float32) + se_b1_ref[...])
    se = jax.nn.sigmoid(jnp.dot(se, se_w2_ref[...],
                                preferred_element_type=jnp.float32)
                        + se_b2_ref[...])                     # [1, C_MID]
    y = y * se

    # ---- project 1x1 (+BN, no activation) + residual -------------------------
    h = (jnp.dot(y.astype(jnp.bfloat16), proj_w_ref[...],
                 preferred_element_type=jnp.float32)
         + proj_b_ref[...] + h)                               # [M, C_STEM]

    # ---- head 1x1 conv (+BN) + SiLU -------------------------------------------
    t = _silu(jnp.dot(h.astype(jnp.bfloat16), head_w_ref[...],
                      preferred_element_type=jnp.float32) + head_b_ref[...])

    # ---- avgpool + flatten + GRL(identity) + classifier -----------------------
    # TODO(synk): GradientReverseLayer only flips gradients in backward; its
    # forward is x * 1.0 (identity), so nothing to emit here (no custom_vjp).
    feat = jnp.sum(t, axis=0, keepdims=True) * (1.0 / float(M))     # [1, C_HEAD]
    logits = jnp.dot(feat, cls_w_ref[...],
                     preferred_element_type=jnp.float32) + cls_b_ref[...]
    out_ref[...] = logits.reshape(1, 1, NUM_CLASSES).astype(out_ref.dtype)


def _bcast_spec(a):
    zeros = (0,) * a.ndim
    return pl.BlockSpec(a.shape, lambda *_: zeros)


# --------------------------------------------------------------------------
# Forward pass (mirrors OSDANet.forward, eval semantics)
# --------------------------------------------------------------------------
def osda_forward(params, x_nchw, reverse=False):
    del reverse  # GRL forward is identity; only the backward pass differs.
    x = jnp.transpose(x_nchw, (0, 2, 3, 1)).astype(jnp.bfloat16)   # NCHW->NHWC
    N, H, W, cin = x.shape
    assert cin == C_IN and H % 2 == 0 and W % 2 == 0
    Ho, Wo = H // 2, W // 2   # Wo a multiple of 8 gives clean sublane layouts

    # Stride-2 phase decomposition of the zero-padded input (cheap XLA strided
    # slices, ~1x HBM traffic; replaces the previous 9x im2col expansion).
    xp = jnp.pad(x, ((0, 0), (1, 1), (1, 1), (0, 0)))
    ee = xp[:, 0::2, 0::2, :]          # all [N, Ho+1, Wo+1, C_IN]
    eo = xp[:, 0::2, 1::2, :]
    oe = xp[:, 1::2, 0::2, :]
    oo = xp[:, 1::2, 1::2, :]

    p = params
    weights = (p["stem_w"], p["stem_b"], p["exp_w"], p["exp_b"],
               p["dw_w"], p["dw_b"],
               p["se_w1"], p["se_b1"], p["se_w2"], p["se_b2"],
               p["proj_w"], p["proj_b"], p["head_w"], p["head_b"],
               p["cls_w"], p["cls_b"])

    phase_spec = pl.BlockSpec((1, Ho + 1, Wo + 1, C_IN), lambda n: (n, 0, 0, 0))
    in_specs = [phase_spec] * 4 + [_bcast_spec(w) for w in weights]

    logits = pl.pallas_call(
        functools.partial(_osda_fused_kernel, Ho=Ho, Wo=Wo),
        grid=(N,),
        out_shape=jax.ShapeDtypeStruct((N, 1, NUM_CLASSES), jnp.float32),
        in_specs=in_specs,
        out_specs=pl.BlockSpec((1, 1, NUM_CLASSES), lambda n: (n, 0, 0)),
        scratch_shapes=[pltpu.VMEM((Ho + 2, Wo + 2, C_MID), jnp.float32)],
        compiler_params=pltpu.CompilerParams(
            dimension_semantics=("parallel",),
            vmem_limit_bytes=48 * 1024 * 1024,
        ),
    )(ee, eo, oe, oo, *weights)
    return logits.reshape(N, NUM_CLASSES)


# --------------------------------------------------------------------------
# Parameters (deterministic init; BN folded into conv weights, eval semantics)
# --------------------------------------------------------------------------
def _fold_bn(w, gamma, beta, mean, var, eps=1e-3):
    scale = gamma / jnp.sqrt(var + eps)
    return w * scale[None, :], beta - mean * scale


def make_params(key):
    keys = iter(jax.random.split(key, 32))

    def nrm(shape, s=0.1):
        return jax.random.normal(next(keys), shape, jnp.float32) * s

    def bn(c):
        g = 1.0 + nrm((c,), 0.05)
        b = nrm((c,), 0.05)
        m = nrm((c,), 0.05)
        v = 1.0 + jnp.abs(nrm((c,), 0.05))
        return g, b, m, v

    bf = jnp.bfloat16
    p = {}
    # stem 3x3/s2 conv, (kh,kw)-major taps, BN folded (tiny -> keep f32)
    stem_w, stem_b = _fold_bn(nrm((9 * C_IN, C_STEM)), *bn(C_STEM))
    p["stem_w"] = stem_w.reshape(9, C_IN, C_STEM)
    p["stem_b"] = stem_b.reshape(1, C_STEM)
    # MBConv expand 1x1 + folded BN (bf16 matmul weights, f32 bias)
    exp_w, exp_b = _fold_bn(nrm((C_STEM, C_MID)), *bn(C_MID))
    p["exp_w"] = exp_w.astype(bf)
    p["exp_b"] = exp_b.reshape(1, C_MID)
    # depthwise 3x3 + folded BN: scale folded directly into the 9 taps
    g, b, m, v = bn(C_MID)
    dw_scale = g / jnp.sqrt(v + 1e-3)
    p["dw_w"] = nrm((9, C_MID)) * dw_scale[None, :]
    p["dw_b"] = (b - m * dw_scale).reshape(1, C_MID)
    # squeeze-excite (tiny; keep f32)
    p["se_w1"] = nrm((C_MID, C_SE))
    p["se_b1"] = nrm((1, C_SE))
    p["se_w2"] = nrm((C_SE, C_MID))
    p["se_b2"] = nrm((1, C_MID))
    # MBConv project 1x1 + folded BN (no activation)
    proj_w, proj_b = _fold_bn(nrm((C_MID, C_STEM)), *bn(C_STEM))
    p["proj_w"] = proj_w.astype(bf)
    p["proj_b"] = proj_b.reshape(1, C_STEM)
    # head 1x1 conv + folded BN + SiLU
    head_w, head_b = _fold_bn(nrm((C_STEM, C_HEAD)), *bn(C_HEAD))
    p["head_w"] = head_w.astype(bf)
    p["head_b"] = head_b.reshape(1, C_HEAD)
    # classifier: Dropout (identity at inference) + Linear(C_HEAD, NUM_CLASSES)
    p["cls_w"] = nrm((C_HEAD, NUM_CLASSES))
    p["cls_b"] = nrm((NUM_CLASSES,)).reshape(1, NUM_CLASSES)
    return p


if __name__ == "__main__":
    key = jax.random.PRNGKey(0)
    k_param, k_x = jax.random.split(key)
    params = make_params(k_param)
    x = jax.random.normal(k_x, (2, 3, 16, 16), jnp.float32)   # NCHW like PyTorch

    fwd = jax.jit(functools.partial(osda_forward, reverse=False))
    logits = fwd(params, x)
    jax.block_until_ready(logits)
    assert logits.shape == (2, NUM_CLASSES)
    assert bool(jnp.all(jnp.isfinite(logits)))
    print("KERNEL_OK")
</pallas_src>

<mosaic_0001>
module attributes {stable_mosaic.version = 11 : i64} {
  func.func @_osda_fused_kernel(%arg0: i32, %arg1: memref<1x9x9x3xbf16, #tpu.memory_space<vmem>>, %arg2: memref<1x9x9x3xbf16, #tpu.memory_space<vmem>>, %arg3: memref<1x9x9x3xbf16, #tpu.memory_space<vmem>>, %arg4: memref<1x9x9x3xbf16, #tpu.memory_space<vmem>>, %arg5: memref<9x3x16xf32, #tpu.memory_space<vmem>>, %arg6: memref<1x16xf32, #tpu.memory_space<vmem>>, %arg7: memref<16x64xbf16, #tpu.memory_space<vmem>>, %arg8: memref<1x64xf32, #tpu.memory_space<vmem>>, %arg9: memref<9x64xf32, #tpu.memory_space<vmem>>, %arg10: memref<1x64xf32, #tpu.memory_space<vmem>>, %arg11: memref<64x4xf32, #tpu.memory_space<vmem>>, %arg12: memref<1x4xf32, #tpu.memory_space<vmem>>, %arg13: memref<4x64xf32, #tpu.memory_space<vmem>>, %arg14: memref<1x64xf32, #tpu.memory_space<vmem>>, %arg15: memref<64x16xbf16, #tpu.memory_space<vmem>>, %arg16: memref<1x16xf32, #tpu.memory_space<vmem>>, %arg17: memref<16x32xbf16, #tpu.memory_space<vmem>>, %arg18: memref<1x32xf32, #tpu.memory_space<vmem>>, %arg19: memref<32x5xf32, #tpu.memory_space<vmem>>, %arg20: memref<1x5xf32, #tpu.memory_space<vmem>>, %arg21: memref<1x1x5xf32, #tpu.memory_space<vmem>>, %arg22: memref<10x10x64xf32, #tpu.memory_space<vmem>>) attributes {dimension_semantics = [#tpu.dimension_semantics<parallel>], iteration_bounds = array<i64: 2>, scalar_prefetch = 0 : i64, scratch_operands = 1 : i64, tpu.core_type = #tpu.core_type<tc>, window_params = [{transform_indices = @transform_0, window_bounds = array<i64: 1, 9, 9, 3>}, {transform_indices = @transform_1, window_bounds = array<i64: 1, 9, 9, 3>}, {transform_indices = @transform_2, window_bounds = array<i64: 1, 9, 9, 3>}, {transform_indices = @transform_3, window_bounds = array<i64: 1, 9, 9, 3>}, {pipeline_mode = #tpu.pipeline_mode<synchronous>, transform_indices = @transform_4, window_bounds = array<i64: 9, 3, 16>}, {pipeline_mode = #tpu.pipeline_mode<synchronous>, transform_indices = @transform_5, window_bounds = array<i64: 1, 16>}, {pipeline_mode = #tpu.pipeline_mode<synchronous>, transform_indices = @transform_6, window_bounds = array<i64: 16, 64>}, {pipeline_mode = #tpu.pipeline_mode<synchronous>, transform_indices = @transform_7, window_bounds = array<i64: 1, 64>}, {pipeline_mode = #tpu.pipeline_mode<synchronous>, transform_indices = @transform_8, window_bounds = array<i64: 9, 64>}, {pipeline_mode = #tpu.pipeline_mode<synchronous>, transform_indices = @transform_9, window_bounds = array<i64: 1, 64>}, {pipeline_mode = #tpu.pipeline_mode<synchronous>, transform_indices = @transform_10, window_bounds = array<i64: 64, 4>}, {pipeline_mode = #tpu.pipeline_mode<synchronous>, transform_indices = @transform_11, window_bounds = array<i64: 1, 4>}, {pipeline_mode = #tpu.pipeline_mode<synchronous>, transform_indices = @transform_12, window_bounds = array<i64: 4, 64>}, {pipeline_mode = #tpu.pipeline_mode<synchronous>, transform_indices = @transform_13, window_bounds = array<i64: 1, 64>}, {pipeline_mode = #tpu.pipeline_mode<synchronous>, transform_indices = @transform_14, window_bounds = array<i64: 64, 16>}, {pipeline_mode = #tpu.pipeline_mode<synchronous>, transform_indices = @transform_15, window_bounds = array<i64: 1, 16>}, {pipeline_mode = #tpu.pipeline_mode<synchronous>, transform_indices = @transform_16, window_bounds = array<i64: 16, 32>}, {pipeline_mode = #tpu.pipeline_mode<synchronous>, transform_indices = @transform_17, window_bounds = array<i64: 1, 32>}, {pipeline_mode = #tpu.pipeline_mode<synchronous>, transform_indices = @transform_18, window_bounds = array<i64: 32, 5>}, {pipeline_mode = #tpu.pipeline_mode<synchronous>, transform_indices = @transform_19, window_bounds = array<i64: 1, 5>}, {transform_indices = @transform_20, window_bounds = array<i64: 1, 1, 5>}]} {
    %c0 = arith.constant 0 : index
    %c0_0 = arith.constant 0 : index
    %c0_1 = arith.constant 0 : index
    %c0_2 = arith.constant 0 : index
    %0 = vector.load %arg1[%c0, %c0_0, %c0_1, %c0_2] : memref<1x9x9x3xbf16, #tpu.memory_space<vmem>>, vector<1x9x9x3xbf16>
    %1 = vector.shape_cast %0 : vector<1x9x9x3xbf16> to vector<9x9x3xbf16>
    %c0_3 = arith.constant 0 : index
    %c0_4 = arith.constant 0 : index
    %c0_5 = arith.constant 0 : index
    %c0_6 = arith.constant 0 : index
    %2 = vector.load %arg2[%c0_3, %c0_4, %c0_5, %c0_6] : memref<1x9x9x3xbf16, #tpu.memory_space<vmem>>, vector<1x9x9x3xbf16>
    %3 = vector.shape_cast %2 : vector<1x9x9x3xbf16> to vector<9x9x3xbf16>
    %c0_7 = arith.constant 0 : index
    %c0_8 = arith.constant 0 : index
    %c0_9 = arith.constant 0 : index
    %c0_10 = arith.constant 0 : index
    %4 = vector.load %arg3[%c0_7, %c0_8, %c0_9, %c0_10] : memref<1x9x9x3xbf16, #tpu.memory_space<vmem>>, vector<1x9x9x3xbf16>
    %5 = vector.shape_cast %4 : vector<1x9x9x3xbf16> to vector<9x9x3xbf16>
    %c0_11 = arith.constant 0 : index
    %c0_12 = arith.constant 0 : index
    %c0_13 = arith.constant 0 : index
    %c0_14 = arith.constant 0 : index
    %6 = vector.load %arg4[%c0_11, %c0_12, %c0_13, %c0_14] : memref<1x9x9x3xbf16, #tpu.memory_space<vmem>>, vector<1x9x9x3xbf16>
    %7 = vector.shape_cast %6 : vector<1x9x9x3xbf16> to vector<9x9x3xbf16>
    %c0_15 = arith.constant 0 : index
    %c0_16 = arith.constant 0 : index
    %c0_17 = arith.constant 0 : index
    %8 = vector.load %arg5[%c0_15, %c0_16, %c0_17] : memref<9x3x16xf32, #tpu.memory_space<vmem>>, vector<9x3x16xf32>
    %cst = arith.constant 0.000000e+00 : f32
    %9 = vector.broadcast %cst : f32 to vector<64x16xf32>
    %10 = vector.extract_strided_slice %1 {offsets = [0, 0, 0], sizes = [8, 8, 3], strides = [1, 1, 1]} : vector<9x9x3xbf16> to vector<8x8x3xbf16>
    %11 = arith.extf %10 : vector<8x8x3xbf16> to vector<8x8x3xf32>
    %12 = vector.shape_cast %11 : vector<8x8x3xf32> to vector<64x3xf32>
    %13 = vector.extract_strided_slice %8 {offsets = [0, 0, 0], sizes = [1, 3, 16], strides = [1, 1, 1]} : vector<9x3x16xf32> to vector<1x3x16xf32>
    %14 = vector.shape_cast %13 : vector<1x3x16xf32> to vector<3x16xf32>
    %cst_18 = arith.constant dense<0.000000e+00> : vector<64x16xf32>
    %15 = tpu.matmul %12, %14, %cst_18 {dimension_numbers = #tpu.dot_dimension_numbers<[1], [0], [0], [1], [0, 0, 1, 1], [], []>} : vector<64x3xf32>, vector<3x16xf32>, vector<64x16xf32> -> vector<64x16xf32>
    %16 = arith.addf %9, %15 : vector<64x16xf32>
    %17 = vector.extract_strided_slice %3 {offsets = [0, 0, 0], sizes = [8, 8, 3], strides = [1, 1, 1]} : vector<9x9x3xbf16> to vector<8x8x3xbf16>
    %18 = arith.extf %17 : vector<8x8x3xbf16> to vector<8x8x3xf32>
    %19 = vector.shape_cast %18 : vector<8x8x3xf32> to vector<64x3xf32>
    %20 = vector.extract_strided_slice %8 {offsets = [1, 0, 0], sizes = [1, 3, 16], strides = [1, 1, 1]} : vector<9x3x16xf32> to vector<1x3x16xf32>
    %21 = vector.shape_cast %20 : vector<1x3x16xf32> to vector<3x16xf32>
    %cst_19 = arith.constant dense<0.000000e+00> : vector<64x16xf32>
    %22 = tpu.matmul %19, %21, %cst_19 {dimension_numbers = #tpu.dot_dimension_numbers<[1], [0], [0], [1], [0, 0, 1, 1], [], []>} : vector<64x3xf32>, vector<3x16xf32>, vector<64x16xf32> -> vector<64x16xf32>
    %23 = arith.addf %16, %22 : vector<64x16xf32>
    %24 = vector.extract_strided_slice %1 {offsets = [0, 1, 0], sizes = [8, 8, 3], strides = [1, 1, 1]} : vector<9x9x3xbf16> to vector<8x8x3xbf16>
    %25 = arith.extf %24 : vector<8x8x3xbf16> to vector<8x8x3xf32>
    %26 = vector.shape_cast %25 : vector<8x8x3xf32> to vector<64x3xf32>
    %27 = vector.extract_strided_slice %8 {offsets = [2, 0, 0], sizes = [1, 3, 16], strides = [1, 1, 1]} : vector<9x3x16xf32> to vector<1x3x16xf32>
    %28 = vector.shape_cast %27 : vector<1x3x16xf32> to vector<3x16xf32>
    %cst_20 = arith.constant dense<0.000000e+00> : vector<64x16xf32>
    %29 = tpu.matmul %26, %28, %cst_20 {dimension_numbers = #tpu.dot_dimension_numbers<[1], [0], [0], [1], [0, 0, 1, 1], [], []>} : vector<64x3xf32>, vector<3x16xf32>, vector<64x16xf32> -> vector<64x16xf32>
    %30 = arith.addf %23, %29 : vector<64x16xf32>
    %31 = vector.extract_strided_slice %5 {offsets = [0, 0, 0], sizes = [8, 8, 3], strides = [1, 1, 1]} : vector<9x9x3xbf16> to vector<8x8x3xbf16>
    %32 = arith.extf %31 : vector<8x8x3xbf16> to vector<8x8x3xf32>
    %33 = vector.shape_cast %32 : vector<8x8x3xf32> to vector<64x3xf32>
    %34 = vector.extract_strided_slice %8 {offsets = [3, 0, 0], sizes = [1, 3, 16], strides = [1, 1, 1]} : vector<9x3x16xf32> to vector<1x3x16xf32>
    %35 = vector.shape_cast %34 : vector<1x3x16xf32> to vector<3x16xf32>
    %cst_21 = arith.constant dense<0.000000e+00> : vector<64x16xf32>
    %36 = tpu.matmul %33, %35, %cst_21 {dimension_numbers = #tpu.dot_dimension_numbers<[1], [0], [0], [1], [0, 0, 1, 1], [], []>} : vector<64x3xf32>, vector<3x16xf32>, vector<64x16xf32> -> vector<64x16xf32>
    %37 = arith.addf %30, %36 : vector<64x16xf32>
    %38 = vector.extract_strided_slice %7 {offsets = [0, 0, 0], sizes = [8, 8, 3], strides = [1, 1, 1]} : vector<9x9x3xbf16> to vector<8x8x3xbf16>
    %39 = arith.extf %38 : vector<8x8x3xbf16> to vector<8x8x3xf32>
    %40 = vector.shape_cast %39 : vector<8x8x3xf32> to vector<64x3xf32>
    %41 = vector.extract_strided_slice %8 {offsets = [4, 0, 0], sizes = [1, 3, 16], strides = [1, 1, 1]} : vector<9x3x16xf32> to vector<1x3x16xf32>
    %42 = vector.shape_cast %41 : vector<1x3x16xf32> to vector<3x16xf32>
    %cst_22 = arith.constant dense<0.000000e+00> : vector<64x16xf32>
    %43 = tpu.matmul %40, %42, %cst_22 {dimension_numbers = #tpu.dot_dimension_numbers<[1], [0], [0], [1], [0, 0, 1, 1], [], []>} : vector<64x3xf32>, vector<3x16xf32>, vector<64x16xf32> -> vector<64x16xf32>
    %44 = arith.addf %37, %43 : vector<64x16xf32>
    %45 = vector.extract_strided_slice %5 {offsets = [0, 1, 0], sizes = [8, 8, 3], strides = [1, 1, 1]} : vector<9x9x3xbf16> to vector<8x8x3xbf16>
    %46 = arith.extf %45 : vector<8x8x3xbf16> to vector<8x8x3xf32>
    %47 = vector.shape_cast %46 : vector<8x8x3xf32> to vector<64x3xf32>
    %48 = vector.extract_strided_slice %8 {offsets = [5, 0, 0], sizes = [1, 3, 16], strides = [1, 1, 1]} : vector<9x3x16xf32> to vector<1x3x16xf32>
    %49 = vector.shape_cast %48 : vector<1x3x16xf32> to vector<3x16xf32>
    %cst_23 = arith.constant dense<0.000000e+00> : vector<64x16xf32>
    %50 = tpu.matmul %47, %49, %cst_23 {dimension_numbers = #tpu.dot_dimension_numbers<[1], [0], [0], [1], [0, 0, 1, 1], [], []>} : vector<64x3xf32>, vector<3x16xf32>, vector<64x16xf32> -> vector<64x16xf32>
    %51 = arith.addf %44, %50 : vector<64x16xf32>
    %52 = vector.extract_strided_slice %1 {offsets = [1, 0, 0], sizes = [8, 8, 3], strides = [1, 1, 1]} : vector<9x9x3xbf16> to vector<8x8x3xbf16>
    %53 = arith.extf %52 : vector<8x8x3xbf16> to vector<8x8x3xf32>
    %54 = vector.shape_cast %53 : vector<8x8x3xf32> to vector<64x3xf32>
    %55 = vector.extract_strided_slice %8 {offsets = [6, 0, 0], sizes = [1, 3, 16], strides = [1, 1, 1]} : vector<9x3x16xf32> to vector<1x3x16xf32>
    %56 = vector.shape_cast %55 : vector<1x3x16xf32> to vector<3x16xf32>
    %cst_24 = arith.constant dense<0.000000e+00> : vector<64x16xf32>
    %57 = tpu.matmul %54, %56, %cst_24 {dimension_numbers = #tpu.dot_dimension_numbers<[1], [0], [0], [1], [0, 0, 1, 1], [], []>} : vector<64x3xf32>, vector<3x16xf32>, vector<64x16xf32> -> vector<64x16xf32>
    %58 = arith.addf %51, %57 : vector<64x16xf32>
    %59 = vector.extract_strided_slice %3 {offsets = [1, 0, 0], sizes = [8, 8, 3], strides = [1, 1, 1]} : vector<9x9x3xbf16> to vector<8x8x3xbf16>
    %60 = arith.extf %59 : vector<8x8x3xbf16> to vector<8x8x3xf32>
    %61 = vector.shape_cast %60 : vector<8x8x3xf32> to vector<64x3xf32>
    %62 = vector.extract_strided_slice %8 {offsets = [7, 0, 0], sizes = [1, 3, 16], strides = [1, 1, 1]} : vector<9x3x16xf32> to vector<1x3x16xf32>
    %63 = vector.shape_cast %62 : vector<1x3x16xf32> to vector<3x16xf32>
    %cst_25 = arith.constant dense<0.000000e+00> : vector<64x16xf32>
    %64 = tpu.matmul %61, %63, %cst_25 {dimension_numbers = #tpu.dot_dimension_numbers<[1], [0], [0], [1], [0, 0, 1, 1], [], []>} : vector<64x3xf32>, vector<3x16xf32>, vector<64x16xf32> -> vector<64x16xf32>
    %65 = arith.addf %58, %64 : vector<64x16xf32>
    %66 = vector.extract_strided_slice %1 {offsets = [1, 1, 0], sizes = [8, 8, 3], strides = [1, 1, 1]} : vector<9x9x3xbf16> to vector<8x8x3xbf16>
    %67 = arith.extf %66 : vector<8x8x3xbf16> to vector<8x8x3xf32>
    %68 = vector.shape_cast %67 : vector<8x8x3xf32> to vector<64x3xf32>
    %69 = vector.extract_strided_slice %8 {offsets = [8, 0, 0], sizes = [1, 3, 16], strides = [1, 1, 1]} : vector<9x3x16xf32> to vector<1x3x16xf32>
    %70 = vector.shape_cast %69 : vector<1x3x16xf32> to vector<3x16xf32>
    %cst_26 = arith.constant dense<0.000000e+00> : vector<64x16xf32>
    %71 = tpu.matmul %68, %70, %cst_26 {dimension_numbers = #tpu.dot_dimension_numbers<[1], [0], [0], [1], [0, 0, 1, 1], [], []>} : vector<64x3xf32>, vector<3x16xf32>, vector<64x16xf32> -> vector<64x16xf32>
    %72 = arith.addf %65, %71 : vector<64x16xf32>
    %c0_27 = arith.constant 0 : index
    %c0_28 = arith.constant 0 : index
    %73 = vector.load %arg6[%c0_27, %c0_28] : memref<1x16xf32, #tpu.memory_space<vmem>>, vector<1x16xf32>
    %74 = vector.broadcast %73 : vector<1x16xf32> to vector<64x16xf32>
    %75 = arith.addf %72, %74 : vector<64x16xf32>
    %76 = arith.negf %75 : vector<64x16xf32>
    %77 = math.exp %76 : vector<64x16xf32>
    %cst_29 = arith.constant 1.000000e+00 : f32
    %78 = vector.broadcast %cst_29 : f32 to vector<64x16xf32>
    %79 = arith.addf %78, %77 : vector<64x16xf32>
    %80 = arith.divf %78, %79 : vector<64x16xf32>
    %81 = arith.mulf %75, %80 : vector<64x16xf32>
    %82 = arith.truncf %81 : vector<64x16xf32> to vector<64x16xbf16>
    %c0_30 = arith.constant 0 : index
    %c0_31 = arith.constant 0 : index
    %83 = vector.load %arg7[%c0_30, %c0_31] : memref<16x64xbf16, #tpu.memory_space<vmem>>, vector<16x64xbf16>
    %cst_32 = arith.constant dense<0.000000e+00> : vector<64x64xf32>
    %84 = tpu.matmul %82, %83, %cst_32 {dimension_numbers = #tpu.dot_dimension_numbers<[1], [0], [0], [1], [0, 0, 1, 1], [], []>} : vector<64x16xbf16>, vector<16x64xbf16>, vector<64x64xf32> -> vector<64x64xf32>
    %c0_33 = arith.constant 0 : index
    %c0_34 = arith.constant 0 : index
    %85 = vector.load %arg8[%c0_33, %c0_34] : memref<1x64xf32, #tpu.memory_space<vmem>>, vector<1x64xf32>
    %86 = vector.broadcast %85 : vector<1x64xf32> to vector<64x64xf32>
    %87 = arith.addf %84, %86 : vector<64x64xf32>
    %88 = arith.negf %87 : vector<64x64xf32>
    %89 = math.exp %88 : vector<64x64xf32>
    %cst_35 = arith.constant 1.000000e+00 : f32
    %90 = vector.broadcast %cst_35 : f32 to vector<64x64xf32>
    %91 = arith.addf %90, %89 : vector<64x64xf32>
    %92 = arith.divf %90, %91 : vector<64x64xf32>
    %93 = arith.mulf %87, %92 : vector<64x64xf32>
    %cst_36 = arith.constant 0.000000e+00 : f32
    %94 = vector.broadcast %cst_36 : f32 to vector<10x10x64xf32>
    %c0_37 = arith.constant 0 : index
    %c0_38 = arith.constant 0 : index
    %c0_39 = arith.constant 0 : index
    %95 = vector.load %arg22[%c0_37, %c0_38, %c0_39] : memref<10x10x64xf32, #tpu.memory_space<vmem>>, vector<10x10x64xf32>
    tpu.vector_store %arg22[%c0_37, %c0_38, %c0_39], %94 {strides = array<i32>} : memref<10x10x64xf32, #tpu.memory_space<vmem>>, vector<10x10x64xf32>,
    %96 = vector.shape_cast %93 : vector<64x64xf32> to vector<8x8x64xf32>
    %c1 = arith.constant 1 : index
    %c1_40 = arith.constant 1 : index
    %c0_41 = arith.constant 0 : index
    %97 = vector.load %arg22[%c1, %c1_40, %c0_41] : memref<10x10x64xf32, #tpu.memory_space<vmem>>, vector<8x8x64xf32>
    tpu.vector_store %arg22[%c1, %c1_40, %c0_41], %96 {strides = array<i32>} : memref<10x10x64xf32, #tpu.memory_space<vmem>>, vector<8x8x64xf32>,
    %c0_42 = arith.constant 0 : index
    %c0_43 = arith.constant 0 : index
    %98 = vector.load %arg9[%c0_42, %c0_43] : memref<9x64xf32, #tpu.memory_space<vmem>>, vector<9x64xf32>
    %cst_44 = arith.constant 0.000000e+00 : f32
    %99 = vector.broadcast %cst_44 : f32 to vector<8x8x64xf32>
    %c0_45 = arith.constant 0 : index
    %c0_46 = arith.constant 0 : index
    %c0_47 = arith.constant 0 : index
    %100 = vector.load %arg22[%c0_45, %c0_46, %c0_47] : memref<10x10x64xf32, #tpu.memory_space<vmem>>, vector<8x8x64xf32>
    %101 = vector.extract_strided_slice %98 {offsets = [0, 0], sizes = [1, 64], strides = [1, 1]} : vector<9x64xf32> to vector<1x64xf32>
    %102 = vector.shape_cast %101 : vector<1x64xf32> to vector<64xf32>
    %103 = vector.shape_cast %102 : vector<64xf32> to vector<1x1x64xf32>
    %104 = vector.broadcast %103 : vector<1x1x64xf32> to vector<8x8x64xf32>
    %105 = arith.mulf %100, %104 : vector<8x8x64xf32>
    %106 = arith.addf %99, %105 : vector<8x8x64xf32>
    %c0_48 = arith.constant 0 : index
    %c1_49 = arith.constant 1 : index
    %c0_50 = arith.constant 0 : index
    %107 = vector.load %arg22[%c0_48, %c1_49, %c0_50] : memref<10x10x64xf32, #tpu.memory_space<vmem>>, vector<8x8x64xf32>
    %108 = vector.extract_strided_slice %98 {offsets = [1, 0], sizes = [1, 64], strides = [1, 1]} : vector<9x64xf32> to vector<1x64xf32>
    %109 = vector.shape_cast %108 : vector<1x64xf32> to vector<64xf32>
    %110 = vector.shape_cast %109 : vector<64xf32> to vector<1x1x64xf32>
    %111 = vector.broadcast %110 : vector<1x1x64xf32> to vector<8x8x64xf32>
    %112 = arith.mulf %107, %111 : vector<8x8x64xf32>
    %113 = arith.addf %106, %112 : vector<8x8x64xf32>
    %c0_51 = arith.constant 0 : index
    %c2 = arith.constant 2 : index
    %c0_52 = arith.constant 0 : index
    %114 = vector.load %arg22[%c0_51, %c2, %c0_52] : memref<10x10x64xf32, #tpu.memory_space<vmem>>, vector<8x8x64xf32>
    %115 = vector.extract_strided_slice %98 {offsets = [2, 0], sizes = [1, 64], strides = [1, 1]} : vector<9x64xf32> to vector<1x64xf32>
    %116 = vector.shape_cast %115 : vector<1x64xf32> to vector<64xf32>
    %117 = vector.shape_cast %116 : vector<64xf32> to vector<1x1x64xf32>
    %118 = vector.broadcast %117 : vector<1x1x64xf32> to vector<8x8x64xf32>
    %119 = arith.mulf %114, %118 : vector<8x8x64xf32>
    %120 = arith.addf %113, %119 : vector<8x8x64xf32>
    %c1_53 = arith.constant 1 : index
    %c0_54 = arith.constant 0 : index
    %c0_55 = arith.constant 0 : index
    %121 = vector.load %arg22[%c1_53, %c0_54, %c0_55] : memref<10x10x64xf32, #tpu.memory_space<vmem>>, vector<8x8x64xf32>
    %122 = vector.extract_strided_slice %98 {offsets = [3, 0], sizes = [1, 64], strides = [1, 1]} : vector<9x64xf32> to vector<1x64xf32>
    %123 = vector.shape_cast %122 : vector<1x64xf32> to vector<64xf32>
    %124 = vector.shape_cast %123 : vector<64xf32> to vector<1x1x64xf32>
    %125 = vector.broadcast %124 : vector<1x1x64xf32> to vector<8x8x64xf32>
    %126 = arith.mulf %121, %125 : vector<8x8x64xf32>
    %127 = arith.addf %120, %126 : vector<8x8x64xf32>
    %c1_56 = arith.constant 1 : index
    %c1_57 = arith.constant 1 : index
    %c0_58 = arith.constant 0 : index
    %128 = vector.load %arg22[%c1_56, %c1_57, %c0_58] : memref<10x10x64xf32, #tpu.memory_space<vmem>>, vector<8x8x64xf32>
    %129 = vector.extract_strided_slice %98 {offsets = [4, 0], sizes = [1, 64], strides = [1, 1]} : vector<9x64xf32> to vector<1x64xf32>
    %130 = vector.shape_cast %129 : vector<1x64xf32> to vector<64xf32>
    %131 = vector.shape_cast %130 : vector<64xf32> to vector<1x1x64xf32>
    %132 = vector.broadcast %131 : vector<1x1x64xf32> to vector<8x8x64xf32>
    %133 = arith.mulf %128, %132 : vector<8x8x64xf32>
    %134 = arith.addf %127, %133 : vector<8x8x64xf32>
    %c1_59 = arith.constant 1 : index
    %c2_60 = arith.constant 2 : index
    %c0_61 = arith.constant 0 : index
    %135 = vector.load %arg22[%c1_59, %c2_60, %c0_61] : memref<10x10x64xf32, #tpu.memory_space<vmem>>, vector<8x8x64xf32>
    %136 = vector.extract_strided_slice %98 {offsets = [5, 0], sizes = [1, 64], strides = [1, 1]} : vector<9x64xf32> to vector<1x64xf32>
    %137 = vector.shape_cast %136 : vector<1x64xf32> to vector<64xf32>
    %138 = vector.shape_cast %137 : vector<64xf32> to vector<1x1x64xf32>
    %139 = vector.broadcast %138 : vector<1x1x64xf32> to vector<8x8x64xf32>
    %140 = arith.mulf %135, %139 : vector<8x8x64xf32>
    %141 = arith.addf %134, %140 : vector<8x8x64xf32>
    %c2_62 = arith.constant 2 : index
    %c0_63 = arith.constant 0 : index
    %c0_64 = arith.constant 0 : index
    %142 = vector.load %arg22[%c2_62, %c0_63, %c0_64] : memref<10x10x64xf32, #tpu.memory_space<vmem>>, vector<8x8x64xf32>
    %143 = vector.extract_strided_slice %98 {offsets = [6, 0], sizes = [1, 64], strides = [1, 1]} : vector<9x64xf32> to vector<1x64xf32>
    %144 = vector.shape_cast %143 : vector<1x64xf32> to vector<64xf32>
    %145 = vector.shape_cast %144 : vector<64xf32> to vector<1x1x64xf32>
    %146 = vector.broadcast %145 : vector<1x1x64xf32> to vector<8x8x64xf32>
    %147 = arith.mulf %142, %146 : vector<8x8x64xf32>
    %148 = arith.addf %141, %147 : vector<8x8x64xf32>
    %c2_65 = arith.constant 2 : index
    %c1_66 = arith.constant 1 : index
    %c0_67 = arith.constant 0 : index
    %149 = vector.load %arg22[%c2_65, %c1_66, %c0_67] : memref<10x10x64xf32, #tpu.memory_space<vmem>>, vector<8x8x64xf32>
    %150 = vector.extract_strided_slice %98 {offsets = [7, 0], sizes = [1, 64], strides = [1, 1]} : vector<9x64xf32> to vector<1x64xf32>
    %151 = vector.shape_cast %150 : vector<1x64xf32> to vector<64xf32>
    %152 = vector.shape_cast %151 : vector<64xf32> to vector<1x1x64xf32>
    %153 = vector.broadcast %152 : vector<1x1x64xf32> to vector<8x8x64xf32>
    %154 = arith.mulf %149, %153 : vector<8x8x64xf32>
    %155 = arith.addf %148, %154 : vector<8x8x64xf32>
    %c2_68 = arith.constant 2 : index
    %c2_69 = arith.constant 2 : index
    %c0_70 = arith.constant 0 : index
    %156 = vector.load %arg22[%c2_68, %c2_69, %c0_70] : memref<10x10x64xf32, #tpu.memory_space<vmem>>, vector<8x8x64xf32>
    %157 = vector.extract_strided_slice %98 {offsets = [8, 0], sizes = [1, 64], strides = [1, 1]} : vector<9x64xf32> to vector<1x64xf32>
    %158 = vector.shape_cast %157 : vector<1x64xf32> to vector<64xf32>
    %159 = vector.shape_cast %158 : vector<64xf32> to vector<1x1x64xf32>
    %160 = vector.broadcast %159 : vector<1x1x64xf32> to vector<8x8x64xf32>
    %161 = arith.mulf %156, %160 : vector<8x8x64xf32>
    %162 = arith.addf %155, %161 : vector<8x8x64xf32>
    %c0_71 = arith.constant 0 : index
    %c0_72 = arith.constant 0 : index
    %163 = vector.load %arg10[%c0_71, %c0_72] : memref<1x64xf32, #tpu.memory_space<vmem>>, vector<1x64xf32>
    %164 = vector.shape_cast %163 : vector<1x64xf32> to vector<1x1x64xf32>
    %165 = vector.broadcast %164 : vector<1x1x64xf32> to vector<8x8x64xf32>
    %166 = arith.addf %162, %165 : vector<8x8x64xf32>
    %167 = arith.negf %166 : vector<8x8x64xf32>
    %168 = math.exp %167 : vector<8x8x64xf32>
    %cst_73 = arith.constant 1.000000e+00 : f32
    %169 = vector.broadcast %cst_73 : f32 to vector<8x8x64xf32>
    %170 = arith.addf %169, %168 : vector<8x8x64xf32>
    %171 = arith.divf %169, %170 : vector<8x8x64xf32>
    %172 = arith.mulf %166, %171 : vector<8x8x64xf32>
    %173 = vector.shape_cast %172 : vector<8x8x64xf32> to vector<64x64xf32>
    %cst_74 = arith.constant dense<0.000000e+00> : vector<64xf32>
    %174 = vector.multi_reduction <add>, %173, %cst_74 [0] : vector<64x64xf32> to vector<64xf32>
    %175 = vector.shape_cast %174 : vector<64xf32> to vector<1x64xf32>
    %cst_75 = arith.constant 1.562500e-02 : f32
    %176 = vector.broadcast %cst_75 : f32 to vector<1x64xf32>
    %177 = arith.mulf %175, %176 : vector<1x64xf32>
    %c0_76 = arith.constant 0 : index
    %c0_77 = arith.constant 0 : index
    %178 = vector.load %arg11[%c0_76, %c0_77] : memref<64x4xf32, #tpu.memory_space<vmem>>, vector<64x4xf32>
    %cst_78 = arith.constant dense<0.000000e+00> : vector<1x4xf32>
    %179 = tpu.matmul %177, %178, %cst_78 {dimension_numbers = #tpu.dot_dimension_numbers<[1], [0], [0], [1], [0, 0, 1, 1], [], []>} : vector<1x64xf32>, vector<64x4xf32>, vector<1x4xf32> -> vector<1x4xf32>
    %c0_79 = arith.constant 0 : index
    %c0_80 = arith.constant 0 : index
    %180 = vector.load %arg12[%c0_79, %c0_80] : memref<1x4xf32, #tpu.memory_space<vmem>>, vector<1x4xf32>
    %181 = arith.addf %179, %180 : vector<1x4xf32>
    %182 = arith.negf %181 : vector<1x4xf32>
    %183 = math.exp %182 : vector<1x4xf32>
    %cst_81 = arith.constant 1.000000e+00 : f32
    %184 = vector.broadcast %cst_81 : f32 to vector<1x4xf32>
    %185 = arith.addf %184, %183 : vector<1x4xf32>
    %186 = arith.divf %184, %185 : vector<1x4xf32>
    %187 = arith.mulf %181, %186 : vector<1x4xf32>
    %c0_82 = arith.constant 0 : index
    %c0_83 = arith.constant 0 : index
    %188 = vector.load %arg13[%c0_82, %c0_83] : memref<4x64xf32, #tpu.memory_space<vmem>>, vector<4x64xf32>
    %cst_84 = arith.constant dense<0.000000e+00> : vector<1x64xf32>
    %189 = tpu.matmul %187, %188, %cst_84 {dimension_numbers = #tpu.dot_dimension_numbers<[1], [0], [0], [1], [0, 0, 1, 1], [], []>} : vector<1x4xf32>, vector<4x64xf32>, vector<1x64xf32> -> vector<1x64xf32>
    %c0_85 = arith.constant 0 : index
    %c0_86 = arith.constant 0 : index
    %190 = vector.load %arg14[%c0_85, %c0_86] : memref<1x64xf32, #tpu.memory_space<vmem>>, vector<1x64xf32>
    %191 = arith.addf %189, %190 : vector<1x64xf32>
    %192 = arith.negf %191 : vector<1x64xf32>
    %193 = math.exp %192 : vector<1x64xf32>
    %cst_87 = arith.constant 1.000000e+00 : f32
    %194 = vector.broadcast %cst_87 : f32 to vector<1x64xf32>
    %195 = arith.addf %194, %193 : vector<1x64xf32>
    %196 = arith.divf %194, %195 : vector<1x64xf32>
    %197 = vector.broadcast %196 : vector<1x64xf32> to vector<64x64xf32>
    %198 = arith.mulf %173, %197 : vector<64x64xf32>
    %199 = arith.truncf %198 : vector<64x64xf32> to vector<64x64xbf16>
    %c0_88 = arith.constant 0 : index
    %c0_89 = arith.constant 0 : index
    %200 = vector.load %arg15[%c0_88, %c0_89] : memref<64x16xbf16, #tpu.memory_space<vmem>>, vector<64x16xbf16>
    %cst_90 = arith.constant dense<0.000000e+00> : vector<64x16xf32>
    %201 = tpu.matmul %199, %200, %cst_90 {dimension_numbers = #tpu.dot_dimension_numbers<[1], [0], [0], [1], [0, 0, 1, 1], [], []>} : vector<64x64xbf16>, vector<64x16xbf16>, vector<64x16xf32> -> vector<64x16xf32>
    %c0_91 = arith.constant 0 : index
    %c0_92 = arith.constant 0 : index
    %202 = vector.load %arg16[%c0_91, %c0_92] : memref<1x16xf32, #tpu.memory_space<vmem>>, vector<1x16xf32>
    %203 = vector.broadcast %202 : vector<1x16xf32> to vector<64x16xf32>
    %204 = arith.addf %201, %203 : vector<64x16xf32>
    %205 = arith.addf %204, %81 : vector<64x16xf32>
    %206 = arith.truncf %205 : vector<64x16xf32> to vector<64x16xbf16>
    %c0_93 = arith.constant 0 : index
    %c0_94 = arith.constant 0 : index
    %207 = vector.load %arg17[%c0_93, %c0_94] : memref<16x32xbf16, #tpu.memory_space<vmem>>, vector<16x32xbf16>
    %cst_95 = arith.constant dense<0.000000e+00> : vector<64x32xf32>
    %208 = tpu.matmul %206, %207, %cst_95 {dimension_numbers = #tpu.dot_dimension_numbers<[1], [0], [0], [1], [0, 0, 1, 1], [], []>} : vector<64x16xbf16>, vector<16x32xbf16>, vector<64x32xf32> -> vector<64x32xf32>
    %c0_96 = arith.constant 0 : index
    %c0_97 = arith.constant 0 : index
    %209 = vector.load %arg18[%c0_96, %c0_97] : memref<1x32xf32, #tpu.memory_space<vmem>>, vector<1x32xf32>
    %210 = vector.broadcast %209 : vector<1x32xf32> to vector<64x32xf32>
    %211 = arith.addf %208, %210 : vector<64x32xf32>
    %212 = arith.negf %211 : vector<64x32xf32>
    %213 = math.exp %212 : vector<64x32xf32>
    %cst_98 = arith.constant 1.000000e+00 : f32
    %214 = vector.broadcast %cst_98 : f32 to vector<64x32xf32>
    %215 = arith.addf %214, %213 : vector<64x32xf32>
    %216 = arith.divf %214, %215 : vector<64x32xf32>
    %217 = arith.mulf %211, %216 : vector<64x32xf32>
    %cst_99 = arith.constant dense<0.000000e+00> : vector<32xf32>
    %218 = vector.multi_reduction <add>, %217, %cst_99 [0] : vector<64x32xf32> to vector<32xf32>
    %219 = vector.shape_cast %218 : vector<32xf32> to vector<1x32xf32>
    %cst_100 = arith.constant 1.562500e-02 : f32
    %220 = vector.broadcast %cst_100 : f32 to vector<1x32xf32>
    %221 = arith.mulf %219, %220 : vector<1x32xf32>
    %c0_101 = arith.constant 0 : index
    %c0_102 = arith.constant 0 : index
    %222 = vector.load %arg19[%c0_101, %c0_102] : memref<32x5xf32, #tpu.memory_space<vmem>>, vector<32x5xf32>
    %cst_103 = arith.constant dense<0.000000e+00> : vector<1x5xf32>
    %223 = tpu.matmul %221, %222, %cst_103 {dimension_numbers = #tpu.dot_dimension_numbers<[1], [0], [0], [1], [0, 0, 1, 1], [], []>} : vector<1x32xf32>, vector<32x5xf32>, vector<1x5xf32> -> vector<1x5xf32>
    %c0_104 = arith.constant 0 : index
    %c0_105 = arith.constant 0 : index
    %224 = vector.load %arg20[%c0_104, %c0_105] : memref<1x5xf32, #tpu.memory_space<vmem>>, vector<1x5xf32>
    %225 = arith.addf %223, %224 : vector<1x5xf32>
    %226 = vector.shape_cast %225 : vector<1x5xf32> to vector<1x1x5xf32>
    %c0_106 = arith.constant 0 : index
    %c0_107 = arith.constant 0 : index
    %c0_108 = arith.constant 0 : index
    %227 = vector.load %arg21[%c0_106, %c0_107, %c0_108] : memref<1x1x5xf32, #tpu.memory_space<vmem>>, vector<1x1x5xf32>
    tpu.vector_store %arg21[%c0_106, %c0_107, %c0_108], %226 {strides = array<i32>} : memref<1x1x5xf32, #tpu.memory_space<vmem>>, vector<1x1x5xf32>,
    return
  }
  func.func @transform_0(%arg0: i32) -> (i32, i32, i32, i32) {
    %c0_i32 = arith.constant 0 : i32
    %c0_i32_0 = arith.constant 0 : i32
    %c0_i32_1 = arith.constant 0 : i32
    %c0_i32_2 = arith.constant 0 : i32
    return %arg0, %c0_i32, %c0_i32_0, %c0_i32_1 : i32, i32, i32, i32
  }
  func.func @transform_1(%arg0: i32) -> (i32, i32, i32, i32) {
    %c0_i32 = arith.constant 0 : i32
    %c0_i32_0 = arith.constant 0 : i32
    %c0_i32_1 = arith.constant 0 : i32
    %c0_i32_2 = arith.constant 0 : i32
    return %arg0, %c0_i32, %c0_i32_0, %c0_i32_1 : i32, i32, i32, i32
  }
  func.func @transform_2(%arg0: i32) -> (i32, i32, i32, i32) {
    %c0_i32 = arith.constant 0 : i32
    %c0_i32_0 = arith.constant 0 : i32
    %c0_i32_1 = arith.constant 0 : i32
    %c0_i32_2 = arith.constant 0 : i32
    return %arg0, %c0_i32, %c0_i32_0, %c0_i32_1 : i32, i32, i32, i32
  }
  func.func @transform_3(%arg0: i32) -> (i32, i32, i32, i32) {
    %c0_i32 = arith.constant 0 : i32
    %c0_i32_0 = arith.constant 0 : i32
    %c0_i32_1 = arith.constant 0 : i32
    %c0_i32_2 = arith.constant 0 : i32
    return %arg0, %c0_i32, %c0_i32_0, %c0_i32_1 : i32, i32, i32, i32
  }
  func.func @transform_4(%arg0: i32) -> (i32, i32, i32) {
    %c0_i32 = arith.constant 0 : i32
    %c0_i32_0 = arith.constant 0 : i32
    %c0_i32_1 = arith.constant 0 : i32
    %c0_i32_2 = arith.constant 0 : i32
    return %c0_i32, %c0_i32_0, %c0_i32_1 : i32, i32, i32
  }
  func.func @transform_5(%arg0: i32) -> (i32, i32) {
    %c0_i32 = arith.constant 0 : i32
    %c0_i32_0 = arith.constant 0 : i32
    %c0_i32_1 = arith.constant 0 : i32
    return %c0_i32, %c0_i32_0 : i32, i32
  }
  func.func @transform_6(%arg0: i32) -> (i32, i32) {
    %c0_i32 = arith.constant 0 : i32
    %c0_i32_0 = arith.constant 0 : i32
    %c0_i32_1 = arith.constant 0 : i32
    return %c0_i32, %c0_i32_0 : i32, i32
  }
  func.func @transform_7(%arg0: i32) -> (i32, i32) {
    %c0_i32 = arith.constant 0 : i32
    %c0_i32_0 = arith.constant 0 : i32
    %c0_i32_1 = arith.constant 0 : i32
    return %c0_i32, %c0_i32_0 : i32, i32
  }
  func.func @transform_8(%arg0: i32) -> (i32, i32) {
    %c0_i32 = arith.constant 0 : i32
    %c0_i32_0 = arith.constant 0 : i32
    %c0_i32_1 = arith.constant 0 : i32
    return %c0_i32, %c0_i32_0 : i32, i32
  }
  func.func @transform_9(%arg0: i32) -> (i32, i32) {
    %c0_i32 = arith.constant 0 : i32
    %c0_i32_0 = arith.constant 0 : i32
    %c0_i32_1 = arith.constant 0 : i32
    return %c0_i32, %c0_i32_0 : i32, i32
  }
  func.func @transform_10(%arg0: i32) -> (i32, i32) {
    %c0_i32 = arith.constant 0 : i32
    %c0_i32_0 = arith.constant 0 : i32
    %c0_i32_1 = arith.constant 0 : i32
    return %c0_i32, %c0_i32_0 : i32, i32
  }
  func.func @transform_11(%arg0: i32) -> (i32, i32) {
    %c0_i32 = arith.constant 0 : i32
    %c0_i32_0 = arith.constant 0 : i32
    %c0_i32_1 = arith.constant 0 : i32
    return %c0_i32, %c0_i32_0 : i32, i32
  }
  func.func @transform_12(%arg0: i32) -> (i32, i32) {
    %c0_i32 = arith.constant 0 : i32
    %c0_i32_0 = arith.constant 0 : i32
    %c0_i32_1 = arith.constant 0 : i32
    return %c0_i32, %c0_i32_0 : i32, i32
  }
  func.func @transform_13(%arg0: i32) -> (i32, i32) {
    %c0_i32 = arith.constant 0 : i32
    %c0_i32_0 = arith.constant 0 : i32
    %c0_i32_1 = arith.constant 0 : i32
    return %c0_i32, %c0_i32_0 : i32, i32
  }
  func.func @transform_14(%arg0: i32) -> (i32, i32) {
    %c0_i32 = arith.constant 0 : i32
    %c0_i32_0 = arith.constant 0 : i32
    %c0_i32_1 = arith.constant 0 : i32
    return %c0_i32, %c0_i32_0 : i32, i32
  }
  func.func @transform_15(%arg0: i32) -> (i32, i32) {
    %c0_i32 = arith.constant 0 : i32
    %c0_i32_0 = arith.constant 0 : i32
    %c0_i32_1 = arith.constant 0 : i32
    return %c0_i32, %c0_i32_0 : i32, i32
  }
  func.func @transform_16(%arg0: i32) -> (i32, i32) {
    %c0_i32 = arith.constant 0 : i32
    %c0_i32_0 = arith.constant 0 : i32
    %c0_i32_1 = arith.constant 0 : i32
    return %c0_i32, %c0_i32_0 : i32, i32
  }
  func.func @transform_17(%arg0: i32) -> (i32, i32) {
    %c0_i32 = arith.constant 0 : i32
    %c0_i32_0 = arith.constant 0 : i32
    %c0_i32_1 = arith.constant 0 : i32
    return %c0_i32, %c0_i32_0 : i32, i32
  }
  func.func @transform_18(%arg0: i32) -> (i32, i32) {
    %c0_i32 = arith.constant 0 : i32
    %c0_i32_0 = arith.constant 0 : i32
    %c0_i32_1 = arith.constant 0 : i32
    return %c0_i32, %c0_i32_0 : i32, i32
  }
  func.func @transform_19(%arg0: i32) -> (i32, i32) {
    %c0_i32 = arith.constant 0 : i32
    %c0_i32_0 = arith.constant 0 : i32
    %c0_i32_1 = arith.constant 0 : i32
    return %c0_i32, %c0_i32_0 : i32, i32
  }
  func.func @transform_20(%arg0: i32) -> (i32, i32, i32) {
    %c0_i32 = arith.constant 0 : i32
    %c0_i32_0 = arith.constant 0 : i32
    %c0_i32_1 = arith.constant 0 : i32
    return %arg0, %c0_i32, %c0_i32_0 : i32, i32, i32
  }
}

</mosaic_0001>

<bundles_post_ra>
// kernel: osda_forward.1
= control target key start
LH: loop header
LB: loop body
LE: loop exit
PB: predicated region body
PF: predicated region fallthrough
CT: control target
= control target key end

     0   :  { %s5133_s0 = inlined_call_operand.vmem [shape: bf16[2,9,9,3], index: 0, kind: input, shape index: {}]   ;;  %s5134_s1 = inlined_call_operand.vmem [shape: bf16[2,9,9,3], index: 1, kind: input, shape index: {}]   ;;  %s5135_s2 = inlined_call_operand.vmem [shape: bf16[2,9,9,3], index: 2, kind: input, shape index: {}]   ;;  %s5136_s3 = inlined_call_operand.vmem [shape: bf16[2,9,9,3], index: 3, kind: input, shape index: {}]   ;;  %s5137_s4 = inlined_call_operand.vmem [shape: f32[9,3,16], index: 4, kind: input, shape index: {}]   ;;  %s5138_s5 = inlined_call_operand.vmem [shape: f32[1,16], index: 5, kind: input, shape index: {}]   ;;  %s5139_s6 = inlined_call_operand.vmem [shape: bf16[16,64], index: 6, kind: input, shape index: {}]   ;;  %s5140_s7 = inlined_call_operand.vmem [shape: f32[1,64], index: 7, kind: input, shape index: {}]   ;;  %s5141_s8 = inlined_call_operand.vmem [shape: f32[9,64], index: 8, kind: input, shape index: {}]   ;;  %s5142_s9 = inlined_call_operand.vmem [shape: f32[1,64], index: 9, kind: input, shape index: {}]   ;;  %s5143_s10 = inlined_call_operand.vmem [shape: f32[64,4], index: 10, kind: input, shape index: {}]   ;;  %s5144_s11 = inlined_call_operand.vmem [shape: f32[1,4], index: 11, kind: input, shape index: {}]   ;;  %s5145_s12 = inlined_call_operand.vmem [shape: f32[4,64], index: 12, kind: input, shape index: {}]   ;;  %s5146_s13 = inlined_call_operand.vmem [shape: f32[1,64], index: 13, kind: input, shape index: {}]   ;;  %s5147_s14 = inlined_call_operand.vmem [shape: bf16[64,16], index: 14, kind: input, shape index: {}]   ;;  %s5148_s15 = inlined_call_operand.vmem [shape: f32[1,16], index: 15, kind: input, shape index: {}]   ;;  %s5149_s16 = inlined_call_operand.vmem [shape: bf16[16,32], index: 16, kind: input, shape index: {}]   ;;  %s5150_s17 = inlined_call_operand.vmem [shape: f32[1,32], index: 17, kind: input, shape index: {}]   ;;  %s5151_s18 = inlined_call_operand.vmem [shape: f32[32,5], index: 18, kind: input, shape index: {}]   ;;  %s5152_s19 = inlined_call_operand.vmem [shape: f32[1,5], index: 19, kind: input, shape index: {}]   ;;  %s5153_s20 = inlined_call_operand.hbm [shape: f32[2,1,5], index: 20, kind: output, shape index: {}]  }
   0x1   :  { %5167 = sst [smem:[#allocation12_spill]] %s5133_s0 }
   0x2   :  { %5168 = sst [smem:[#allocation13_spill]] %s5134_s1 }
   0x3   :  { %5169 = sst [smem:[#allocation14_spill]] %s5135_s2 }
   0x4   :  { %5170 = sst [smem:[#allocation15_spill]] %s5136_s3 }
   0x5   :  { %5171 = sst [smem:[#allocation16_spill]] %s5137_s4 }
   0x6   :  { %5172 = sst [smem:[#allocation17_spill]] %s5153_s20 }
   0x7   :  { %25 = vsyncpa [#allocation4], 0 }
   0x8   :  { %27 = vsyncpa [#allocation4 + $0x1], 0  ;;  %s4219_s1 = smov 0   ;;  %s4221_s22 = smov 0  }
   0x9   :  { %s4223_s23 = smov 0   ;;  %s4225_s24 = smov 0  }
   0xa LB: > { %5173 = sst [smem:[#allocation6_spill]] %s4096_s1  ;;  %s4240_s2 = sadd.s32 4294967295, %s4108_s24   ;;  %s4108_s24 = sphi %s4225_s24, %s5193_s24   ;;  %s4104_s23 = sphi %s4223_s23, %s5195_s23   ;;  %s4100_s22 = sphi %s4221_s22, %s5197_s22   ;;  %s4096_s1 = sphi %s4219_s1, %s5196_s1  }
   0xb   : > { %5174 = sst [smem:[#allocation7_spill]] %s4104_s23  ;;  %s3311_s25 = sadd.s32 4294967294, %s4108_s24  }
   0xc   : > { %5175 = sst [smem:[#allocation8_spill]] %s4108_s24  ;;  %s4244_s3 = sadd.s32 1, %s4108_s24  }
   0xd   : > { %5176 = sst [smem:[#allocation9_spill]] %s4244_s3  ;;  %s480_s26 = sadd.s32 1, %s4104_s23 }
   0xe   : > { %s477_s27 = ssub.s32 %s4108_s24, %s4244_s3  ;;  %p490_p0 = scmp.ne.s32.totalorder %s4104_s23, %s4100_s22 }
   0xf   : > { %p478_p1 = scmp.eq.s32.totalorder %s477_s27, 0  ;;  %p491_p2 = scmp.eq.s32.totalorder %s4240_s2, 1 }
  0x10   : > { %p496_p3 = scmp.ne.s32.totalorder %s4100_s22, %s4096_s1  ;;  %p497_p4 = scmp.eq.s32.totalorder %s3311_s25, 1 }
  0x11   : > { %s4255_s28 = scalar_select %p478_p1, %s4104_s23, %s480_s26  }
  0x12   : > { %p4257_p5 = por %p491_p2, %p490_p0  ;;  %p4261_p6 = por %p497_p4, %p496_p3 }
  0x13   : > { %5177 = sst [smem:[#allocation10_spill]] %s4255_s28  ;;  %p3314_p7 = scmp.ge.s32.totalorder %s4108_s24, 1 }
  0x14   : > { %s5179_s29 = scalar_select %p4261_p6, 1, 0 }
  0x15   : > { %p595_p8 = scmp.lt.s32.totalorder %s4108_s24, 3 }
  0x16   : > { %5180 = sst [smem:[#allocation11_spill]] %s5179_s29 }
  0x17   : > { %p596_p9 = pnand %p3314_p7, %p595_p8 }
  0x18   : > { %s5181_s21 = sld [smem:[#allocation16_spill]] (!%p596_p9)  ;;  %vm789_vm0 = vcmask (!%p596_p9), 1042432   ;;  %p667_p10 = scmp.lt.s32.totalorder (!%p596_p9), %s4240_s2, 1  ;;  %vm764_vm1 = vcmask (!%p596_p9), 23552   ;;  %vm1046_vm2 = vcmask (!%p596_p9), 1046528   ;;  %vm2124_vm3 = vcmask (!%p596_p9), 130048  }
  0x19   : > { %599 = sbr.rel (%p596_p9) target bundleno = 1944 (0x798), region = 100  ;;  %s5182_s26 = sld [smem:[#allocation12_spill]] (!%p596_p9)  ;;  %vm2258_vm4 = vcmask (!%p596_p9), 523264   ;;  %vm2260_vm5 = vcmask (!%p596_p9), 517120   ;;  %vm4112_vm6 = vmmov (!%p596_p9), 0   ;;  %vm2732_vm7 = vcmask (!%p596_p9), 1043456  }
  0x1a   : > { %s5183_s0 = sld [smem:[#allocation14_spill]] (!%p596_p9)  ;;  %s5184_s24 = sld [smem:[#allocation13_spill]] (!%p596_p9)  ;;  %vm2728_vm8 = vcmask (!%p596_p9), 31744   ;;  %vm3104_vm9 = vcmask (!%p596_p9), 261120   ;;  %vm3205_vm10 = vcmask (!%p596_p9), 32768  }
  0x1b   : > { %s5185_s30 = sld [smem:[#allocation15_spill]] (!%p596_p9)  ;;  %s3462_s1 = sshll.u32 (!%p596_p9), %s4240_s2, 4 }
  0x1e   : > { %v4270_v0 = vld [vmem:[%s5181_s21 + $0x8] sm:$0x7] (!%p596_p9)  ;;  %v742_v1 = vld [vmem:[%s5181_s21 + $0xc] sm:$0x7] (!%p596_p9)  ;;  %v740_v2 = vld [vmem:[%s5181_s21 + $0x4] sm:$0x7] (!%p596_p9) }
  0x1f   : > { %3608 = vmatprep.subr.msk.mxu0 (!%p596_p9), %vm789_vm0, %v4270_v0  ;;  %3580 = vmatprep.subr.msk.mxu1 (!%p596_p9), %vm789_vm0, %v740_v2  ;;  %v4289_v3 = vld [vmem:[%s5181_s21] sm:$0x7] (!%p596_p9)  ;;  %v743_v36 = vld [vmem:[%s5181_s21 + $0x10] sm:$0x7] (!%p596_p9)  ;;  %v744_v59 = vld [vmem:[%s5181_s21 + $0x14] sm:$0x7] (!%p596_p9) }
  0x20   : > { %3609 = vmatpush3.msk.msra.mxu0 %vm789_vm0, %v4270_v0  ;;  %s668_s27 = scalar_select %p667_p10, %s4240_s2, 1  ;;  %3581 = vmatpush3.msk.msra.mxu1 %vm789_vm0, %v740_v2 }
  0x21   : > { %3622 = vmatprep.subr.msk.mxu0 %vm789_vm0, %v742_v1  ;;  %3594 = vmatprep.subr.msk.mxu1 %vm789_vm0, %v4289_v3  ;;  %s4113_s2 = smov [#allocation3]  }
  0x22   : > { %s4291_s25 = smul.u32 72, %s668_s27 }
  0x24   : > { %s4300_s3 = scalar_lea.vmem %s5182_s26, %s4291_s25  ;;  %s4342_s23 = scalar_lea.vmem %s5183_s0, %s4291_s25 }
  0x25   : > { %v4303_v4 = vld [vmem:[%s4300_s3] ss:$8 sps:$4 sm:$0xff]   ;;  %v689_v5 = vld [vmem:[%s4300_s3 + $0x4] sm:$0x1]  ;;  %v691_v6 = vld [vmem:[%s4300_s3 + $0xc] sm:$0x1]  ;;  %s4351_s20 = scalar_lea.vmem %s5184_s24, %s4291_s25  ;;  %s4451_s0 = scalar_lea.vmem %s5185_s30, %s4291_s25 }
  0x26   : > { %v748_v7 = vunpack.c.l.bf16 %v4303_v4  ;;  %v1030_v8 = vunpack.c.l.bf16 %v689_v5  ;;  %v4309_v9 = vunpack.c.h.bf16 %v4303_v4  ;;  %v1031_v10 = vunpack.c.l.bf16 %v691_v6  ;;  %v692_v11 = vld [vmem:[%s4300_s3 + $0x10] ss:$8 sps:$4 sm:$0xff]   ;;  %v693_v12 = vld [vmem:[%s4300_s3 + $0x14] sm:$0x1]  ;;  %v695_v13 = vld [vmem:[%s4300_s3 + $0x1c] sm:$0x1] }
  0x27   : > { %v4314_v14 = vunpack.c.l.bf16 %v692_v11  ;;  %v1032_v15 = vunpack.c.l.bf16 %v693_v12  ;;  %v4316_v16 = vunpack.c.h.bf16 %v692_v11  ;;  %v1033_v17 = vunpack.c.l.bf16 %v695_v13  ;;  %v696_v18 = vld [vmem:[%s4300_s3 + $0x20] ss:$8 sps:$4 sm:$0xff]   ;;  %v697_v19 = vld [vmem:[%s4300_s3 + $0x24] sm:$0x1]  ;;  %v699_v24 = vld [vmem:[%s4300_s3 + $0x2c] sm:$0x1] }
  0x28   : > { %v1047_v20 = vrot.slane %v748_v7, 1  ;;  %v1048_v21 = vrot.slane %v1030_v8, 1  ;;  %v1050_v22 = vrot.slane %v4309_v9, 1  ;;  %v1051_v23 = vrot.slane %v1031_v10, 1  ;;  %v4367_v43 = vld [vmem:[%s4342_s23] ss:$8 sps:$4 sm:$0xff]  }
  0x29   : > { %v1053_v25 = vrot.slane %v4314_v14, 1  ;;  %v1054_v26 = vrot.slane %v1032_v15, 1  ;;  %v1056_v27 = vrot.slane %v4316_v16, 1  ;;  %v1057_v28 = vrot.slane %v1033_v17, 1  ;;  %v4371_v44 = vld [vmem:[%s4351_s20] ss:$8 sps:$4 sm:$0xff]  }
  0x2a   : > { %v1049_v29 = vsel %vm1046_vm2, %v1047_v20, %v1048_v21  ;;  %v4328_v30 = vsel %vm1046_vm2, %v1050_v22, %v1051_v23  ;;  %v4330_v31 = vunpack.c.l.bf16 %v696_v18  ;;  %v1034_v32 = vunpack.c.l.bf16 %v697_v19  ;;  %v4376_v45 = vld [vmem:[%s4351_s20 + $0x10] ss:$8 sps:$4 sm:$0xff]   ;;  %v4392_v52 = vld [vmem:[%s4351_s20 + $0x20] ss:$8 sps:$4 sm:$0xff]   ;;  %v701_v21 = vld [vmem:[%s4300_s3 + $0x34] sm:$0x1] }
  0x2b   : > { %3610 = vmatprep.mubr.msk.f32.mxu0 %vm764_vm1, %v1049_v29  ;;  %v4334_v33 = vsel %vm1046_vm2, %v1053_v25, %v1054_v26  ;;  %v4336_v34 = vunpack.c.h.bf16 %v696_v18  ;;  %v1035_v35 = vunpack.c.l.bf16 %v699_v24  ;;  %v4360_v39 = vsel %vm1046_vm2, %v1056_v27, %v1057_v28  ;;  %v4387_v50 = vld [vmem:[%s4342_s23 + $0x10] ss:$8 sps:$4 sm:$0xff]   ;;  %v4409_v56 = vld [vmem:[%s4342_s23 + $0x20] ss:$8 sps:$4 sm:$0xff]   ;;  %v716_v25 = vld [vmem:[%s4342_s23 + $0x4] sm:$0x1] }
  0x2c   : > { %3611 = vmatmul.mubr.msk.f32.vlgmr.msra.gmra.mrb[0].mxu0 %vm764_vm1, %v4328_v30  ;;  %v1059_v37 = vrot.slane %v4330_v31, 1  ;;  %v1060_v38 = vrot.slane %v1034_v32, 1  ;;  %v1203_v47 = vunpack.c.l.bf16 %v4367_v43  ;;  %v756_v48 = vunpack.c.l.bf16 %v4371_v44  ;;  %v4413_v58 = vld [vmem:[%s4351_s20 + $0x30] ss:$8 sps:$4 sm:$0xff]   ;;  %v731_v12 = vld [vmem:[%s4451_s0] ss:$8 sps:$4 sm:$0xff]  }
  0x2d   : > { %3623 = vmatpush3.msk.msra.mxu0 %vm789_vm0, %v742_v1  ;;  %3613 = vmatprep.mubr.msk.f32.mxu0 %vm764_vm1, %v4334_v33  ;;  %v1062_v40 = vrot.slane %v4336_v34, 1  ;;  %v1063_v41 = vrot.slane %v1035_v35, 1  ;;  %v757_v49 = vunpack.c.h.bf16 %v4371_v44  ;;  %v758_v51 = vunpack.c.l.bf16 %v4376_v45  ;;  %v4437_v1 = vld [vmem:[%s4300_s3 + $0x40] sm:$0xf]  ;;  %v4440_v2 = vld [vmem:[%s4342_s23 + $0x30] ss:$8 sps:$4 sm:$0xff]  }
  0x2e   : > { %v4364_v42 = vsel %vm1046_vm2, %v1059_v37, %v1060_v38  ;;  %3636 = vmatprep.subr.msk.mxu0 %vm789_vm0, %v743_v36  ;;  %3582 = vmatprep.mubr.msk.f32.mxu1 %vm764_vm1, %v756_v48  ;;  %v1204_v53 = vunpack.c.h.bf16 %v4367_v43  ;;  %v759_v54 = vunpack.c.h.bf16 %v4376_v45  ;;  %v1205_v55 = vunpack.c.l.bf16 %v4387_v50  ;;  %v733_v20 = vld [vmem:[%s4451_s0 + $0x10] ss:$8 sps:$4 sm:$0xff]   ;;  %v718_v35 = vld [vmem:[%s4342_s23 + $0xc] sm:$0x1]  ;;  %v703_v38 = vld [vmem:[%s4300_s3 + $0x3c] sm:$0x1] }
  0x2f   : > { %v4381_v46 = vsel %vm1046_vm2, %v1062_v40, %v1063_v41  ;;  %3583 = vmatmul.mubr.msk.f32.vlgmr.msra.gmra.mrb[0].mxu1 %vm764_vm1, %v757_v49  ;;  %v760_v57 = vunpack.c.l.bf16 %v4392_v52  ;;  %v1206_v60 = vunpack.c.h.bf16 %v4387_v50  ;;  %v761_v61 = vunpack.c.h.bf16 %v4392_v52  ;;  %v700_v4 = vld [vmem:[%s4300_s3 + $0x30] ss:$8 sps:$4 sm:$0xff]   ;;  %v720_v40 = vld [vmem:[%s4342_s23 + $0x14] sm:$0x1]  ;;  %v746_v50 = vld [vmem:[%s5181_s21 + $0x1c] sm:$0x7] }
  0x30   : > { %3614 = vmatmul.mubr.msk.f32.gmra.mrb[2].mxu0 %vm764_vm1, %v4360_v39  ;;  %3585 = vmatprep.mubr.msk.f32.mxu1 %vm764_vm1, %v758_v51  ;;  %v1207_v62 = vunpack.c.l.bf16 %v4409_v56  ;;  %v762_v63 = vunpack.c.l.bf16 %v4413_v58  ;;  %v1208_v5 = vunpack.c.h.bf16 %v4409_v56  ;;  %v763_v6 = vunpack.c.h.bf16 %v4413_v58  ;;  %v4506_v26 = vld [vmem:[%s5181_s21 + $0x18] sm:$0x7]  ;;  %s5189_s30 = sld [smem:[#allocation17_spill]]  ;;  %s4050_s26 = sshll.u32 %s4113_s2, 4  ;;  %s4051_s26 = int_to_ptr.vmem [resolvable:$false] %s4050_s26 }
  0x31   : > { %3616 = vmatprep.mubr.msk.f32.mxu0 %vm764_vm1, %v4364_v42  ;;  %3595 = vmatpush3.msk.msra.mxu1 %vm789_vm0, %v4289_v3  ;;  %v705_v3 = vld [vmem:[%s4300_s3 + $0x44] sm:$0x1]  ;;  %v1671_v8 = vunpack.c.l.bf16 %v4437_v1  ;;  %v1209_v10 = vunpack.c.l.bf16 %v4440_v2  ;;  %v1210_v17 = vunpack.c.h.bf16 %v4440_v2  ;;  %v1351_v18 = vunpack.c.l.bf16 %v731_v12  ;;  %v737_v29 = vld [vmem:[%s4451_s0 + $0x30] ss:$8 sps:$4 sm:$0xff]   ;;  %s665_s3 = sand.u32 1, %s4100_s22  }
  0x32   : > { %3795 = vmatprep.subr.msk.mxu1 %vm789_vm0, %v4270_v0  ;;  %v1911_v11 = vunpack.c.l.bf16 %v705_v3  ;;  %v1352_v22 = vunpack.c.h.bf16 %v731_v12  ;;  %v1353_v23 = vunpack.c.l.bf16 %v733_v20  ;;  %v1036_v24 = vunpack.c.l.bf16 %v701_v21  ;;  %v724_v21 = vld [vmem:[%s4342_s23 + $0x24] sm:$0x1]  ;;  %s3208_s25 = scalar_lea.sflag [#allocation4], %s665_s3 }
  0x33   : > { %3586 = vmatmul.mubr.msk.f32.gmra.mrb[2].mxu1 %vm764_vm1, %v759_v54  ;;  %v1913_v13 = vrot.slane %v1671_v8, 1  ;;  %v1354_v27 = vunpack.c.h.bf16 %v733_v20  ;;  %v4511_v28 = vunpack.c.l.bf16 %v700_v4  ;;  %v1499_v32 = vunpack.c.l.bf16 %v716_v25 }
  0x34   : > { %3617 = vmatmul.mubr.msk.f32.gmra.mrb[4].mxu0 %vm764_vm1, %v4381_v46  ;;  %3588 = vmatprep.mubr.msk.f32.mxu1 %vm764_vm1, %v760_v57  ;;  %v1914_v15 = vrot.slane %v1911_v11, 1  ;;  %v1066_v37 = vrot.slane %v1036_v24, 1  ;;  %v4527_v48 = vunpack.c.h.bf16 %v700_v4  ;;  %v1500_v3 = vunpack.c.l.bf16 %v718_v35 }
  0x35   : > { %3624 = vmatprep.mubr.msk.f32.mxu0 %vm764_vm1, %v1203_v47  ;;  %v1037_v11 = vunpack.c.l.bf16 %v703_v38  ;;  %v1515_v12 = vrot.slane %v1203_v47, 1  ;;  %v1536_v56 = vrot.slane %v1210_v17, 1 }
  0x36   : > { %v4486_v19 = vsel %vm1046_vm2, %v1913_v13, %v1914_v15  ;;  %v1516_v13 = vrot.slane %v1499_v32, 1  ;;  %v1501_v15 = vunpack.c.l.bf16 %v720_v40  ;;  %v1519_v47 = vrot.slane %v1500_v3, 1  ;;  %v730_v3 = vld [vmem:[%s4342_s23 + $0x3c] sm:$0x1] }
  0x37   : > { %3589 = vmatmul.mubr.msk.f32.gmra.mrb[4].mxu1 %vm764_vm1, %v761_v61  ;;  %v1069_v24 = vrot.slane %v1037_v11, 1  ;;  %v1524_v32 = vrot.slane %v1206_v60, 1  ;;  %v1527_v40 = vrot.slane %v1207_v62, 1 }
  0x38   : > { %3625 = vmatmul.mubr.msk.f32.vlgmr.msra.gmra.mrb[0].mxu0 %vm764_vm1, %v1204_v53  ;;  %3591 = vmatprep.mubr.msk.f32.mxu1 %vm764_vm1, %v762_v63  ;;  %v1517_v25 = vsel %vm1046_vm2, %v1515_v12, %v1516_v13  ;;  %v1522_v43 = vrot.slane %v1501_v15, 1  ;;  %v1506_v12 = vunpack.c.l.bf16 %v730_v3  ;;  %v1533_v15 = vrot.slane %v1209_v10, 1 }
  0x39   : > { %3637 = vmatpush3.msk.msra.mxu0 %vm789_vm0, %v743_v36  ;;  %3627 = vmatprep.mubr.msk.f32.mxu0 %vm764_vm1, %v1205_v55  ;;  %v1065_v36 = vrot.slane %v4511_v28, 1 }
  0x3a   : > { %3650 = vmatprep.subr.msk.mxu0 %vm789_vm0, %v744_v59 }
  0x3b   : > { %3592 = vmatmul.mubr.msk.f32.gmra.mrb[6].mxu1 %vm764_vm1, %v763_v6  ;;  %v4536_v20 = vsel %vm1046_vm2, %v1065_v36, %v1066_v37 }
  0x3c   : > { %3628 = vmatmul.mubr.msk.f32.gmra.mrb[2].mxu0 %vm764_vm1, %v1206_v60  ;;  %3596 = vmatprep.mubr.msk.f32.mxu1 %vm764_vm1, %v748_v7  ;;  %v735_v7 = vld [vmem:[%s4451_s0 + $0x20] ss:$8 sps:$4 sm:$0xff]   ;;  %s5091_s0 = scalar_lea.hbm %s5189_s30, %s3462_s1 }
  0x3d   : > { %3630 = vmatprep.mubr.msk.f32.mxu0 %vm764_vm1, %v1207_v62  ;;  %v1356_v41 = vunpack.c.h.bf16 %v735_v7  ;;  %v1530_v62 = vrot.slane %v1208_v5, 1 }
  0x3f   : > { %3597 = vmatmul.mubr.msk.f32.vlgmr.msra.gmra.mrb[0].mxu1 %vm764_vm1, %v4309_v9 }
  0x40   : > { %3631 = vmatmul.mubr.msk.f32.gmra.mrb[4].mxu0 %vm764_vm1, %v1208_v5  ;;  %3599 = vmatprep.mubr.msk.f32.mxu1 %vm764_vm1, %v4314_v14  ;;  %v1537_v5 = vrot.slane %v1506_v12, 1 }
  0x41   : > { %3633 = vmatprep.mubr.msk.f32.mxu0 %vm764_vm1, %v1209_v10  ;;  %3796 = vmatpush3.msk.msra.mxu1 %vm789_vm0, %v4270_v0  ;;  %v1355_v0 = vunpack.c.l.bf16 %v735_v7  ;;  %v1068_v7 = vrot.slane %v4527_v48, 1 }
  0x42   : > { %v1538_v10 = vsel %vm1046_vm2, %v1536_v56, %v1537_v5 }
  0x43   : > { %3600 = vmatmul.mubr.msk.f32.gmra.mrb[2].mxu1 %vm764_vm1, %v4316_v16  ;;  %v1070_v38 = vsel %vm1046_vm2, %v1068_v7, %v1069_v24 }
  0x44   : > { %3634 = vmatmul.mubr.msk.f32.gmra.mrb[6].mxu0 %vm764_vm1, %v1210_v17  ;;  %3602 = vmatprep.mubr.msk.f32.mxu1 %vm764_vm1, %v4330_v31 }
  0x45   : > { %3638 = vmatprep.mubr.msk.f32.mxu0 %vm764_vm1, %v1351_v18  ;;  %v722_v18 = vld [vmem:[%s4342_s23 + $0x1c] sm:$0x1] }
  0x46   : > { %v1502_v4 = vunpack.c.l.bf16 %v722_v18 }
  0x47   : > { %3603 = vmatmul.mubr.msk.f32.gmra.mrb[4].mxu1 %vm764_vm1, %v4336_v34 }
  0x48   : > { %3639 = vmatmul.mubr.msk.f32.vlgmr.msra.gmra.mrb[0].mxu0 %vm764_vm1, %v1352_v22  ;;  %3605 = vmatprep.mubr.msk.f32.mxu1 %vm764_vm1, %v4511_v28  ;;  %v1358_v22 = vunpack.c.h.bf16 %v737_v29  ;;  %v1525_v36 = vrot.slane %v1502_v4, 1 }
  0x49   : > { %3651 = vmatpush3.msk.msra.mxu0 %vm789_vm0, %v744_v59  ;;  %3641 = vmatprep.mubr.msk.f32.mxu0 %vm764_vm1, %v1353_v23  ;;  %v1357_v59 = vunpack.c.l.bf16 %v737_v29  ;;  %v1518_v23 = vrot.slane %v1204_v53, 1  ;;  %v1503_v53 = vunpack.c.l.bf16 %v724_v21  ;;  %v728_v29 = vld [vmem:[%s4342_s23 + $0x34] sm:$0x1] }
  0x4a   : > { %3664 = vmatprep.subr.msk.mxu0 %vm789_vm0, %v4506_v26  ;;  %v1526_v60 = vsel %vm1046_vm2, %v1524_v32, %v1525_v36 }
  0x4b   : > { %3606 = vmatmul.mubr.msk.f32.gmra.mrb[6].mxu1 %vm764_vm1, %v4527_v48  ;;  %v1520_v35 = vsel %vm1046_vm2, %v1518_v23, %v1519_v47 }
  0x4c   : > { %3642 = vmatmul.mubr.msk.f32.gmra.mrb[2].mxu0 %vm764_vm1, %v1354_v27  ;;  %3619 = vmatprep.mubr.msk.f32.mxu1 %vm764_vm1, %v4536_v20  ;;  %v1521_v27 = vrot.slane %v1205_v55, 1 }
  0x4d   : > { %3644 = vmatprep.mubr.msk.f32.mxu0 %vm764_vm1, %v1355_v0  ;;  %v726_v0 = vld [vmem:[%s4342_s23 + $0x2c] sm:$0x1]  ;;  %s4052_s23 = scalar_lea.vmem %s4051_s26, 32 }
  0x4e   : > { %v1504_v37 = vunpack.c.l.bf16 %v726_v0  ;;  %v1523_v55 = vsel %vm1046_vm2, %v1521_v27, %v1522_v43 }
  0x50   : > { %3645 = vmatmul.mubr.msk.f32.gmra.mrb[4].mxu0 %vm764_vm1, %v1356_v41  ;;  %v1528_v41 = vrot.slane %v1503_v53, 1  ;;  %v1531_v11 = vrot.slane %v1504_v37, 1 }
  0x51   : > { %3647 = vmatprep.mubr.msk.f32.mxu0 %vm764_vm1, %v1357_v59  ;;  %v1505_v59 = vunpack.c.l.bf16 %v728_v29 }
  0x52   : > { %v1529_v13 = vsel %vm1046_vm2, %v1527_v40, %v1528_v41 }
  0x53   : > { %3620 = vmatmul.mubr.msk.f32.vlgmr.msra.gmra.mrb[6].mxu1 %vm764_vm1, %v1070_v38  ;;  %v1534_v18 = vrot.slane %v1505_v59, 1 }
  0x54   : > { %3648 = vmatmul.mubr.msk.f32.gmra.mrb[6].mxu0 %vm764_vm1, %v1358_v22  ;;  %v747_v22 = vld [vmem:[%s5181_s21 + $0x20] sm:$0x7] }
  0x55   : > { %3652 = vmatprep.mubr.msk.f32.mxu0 %vm764_vm1, %v1517_v25  ;;  %v1535_v21 = vsel %vm1046_vm2, %v1533_v15, %v1534_v18 }
  0x58   : > { %3653 = vmatmul.mubr.msk.f32.vlgmr.msra.gmra.mrb[0].mxu0 %vm764_vm1, %v1520_v35 }
  0x59   : > { %3665 = vmatpush3.msk.msra.mxu0 %vm789_vm0, %v4506_v26  ;;  %3655 = vmatprep.mubr.msk.f32.mxu0 %vm764_vm1, %v1523_v55  ;;  %v1532_v26 = vsel %vm1046_vm2, %v1530_v62, %v1531_v11 }
  0x5a   : > { %3678 = vmatprep.subr.msk.mxu0 %vm789_vm0, %v746_v50 }
  0x5c   : > { %3656 = vmatmul.mubr.msk.f32.gmra.mrb[2].mxu0 %vm764_vm1, %v1526_v60 }
  0x5d   : > { %3658 = vmatprep.mubr.msk.f32.mxu0 %vm764_vm1, %v1529_v13 }
  0x60   : > { %3659 = vmatmul.mubr.msk.f32.gmra.mrb[4].mxu0 %vm764_vm1, %v1532_v26 }
  0x61   : > { %3661 = vmatprep.mubr.msk.f32.mxu0 %vm764_vm1, %v1535_v21 }
  0x64   : > { %3662 = vmatmul.mubr.msk.f32.gmra.mrb[6].mxu0 %vm764_vm1, %v1538_v10 }
  0x65   : > { %3666 = vmatprep.mubr.msk.f32.mxu0 %vm764_vm1, %v4309_v9  ;;  %v714_v9 = vld [vmem:[%s4351_s20 + $0x40] sm:$0xf]  ;;  %s666_s20 = scalar_lea.vmem [#allocation3], %s665_s3 }
  0x66   : > { %s3220_s24 = sshll.u32 %s666_s20, 4  ;;  %s5093_s24 = int_to_ptr.vmem [resolvable:$true] %s3220_s24 }
  0x67   : > { %s4046_s28 = scalar_lea.vmem %s5093_s24, 16  ;;  %p4053_p0 = scmp.lt.s32.totalorder %s5093_s24, %s4051_s26 }
  0x68   : > { %3667 = vmatmul.mubr.msk.f32.vlgmr.msra.gmra.mrb[0].mxu0 %vm764_vm1, %v4314_v14  ;;  %v1791_v14 = vunpack.c.l.bf16 %v714_v9  ;;  %p4047_p11 = scmp.ne.s32.totalorder %s5093_s24, %s4046_s28  ;;  %p4054_p1 = scmp.lt.s32.totalorder %s4052_s23, %s4046_s28 }
  0x69   : > { %3679 = vmatpush3.msk.msra.mxu0 %vm789_vm0, %v746_v50  ;;  %3669 = vmatprep.mubr.msk.f32.mxu0 %vm764_vm1, %v4316_v16  ;;  %v3904_v16 = vld [vmem:[%s5139_s6] sm:$0xff]  }
  0x6a   : > { %3692 = vmatprep.subr.msk.mxu0 %vm789_vm0, %v747_v22  ;;  %3706 = vmatprep.subr.bf16.mxu1 %v3904_v16  ;;  %p4048_p12 = pnand %p4047_p11, %p4257_p5  ;;  %p4055_p2 = por %p4054_p1, %p4053_p0 }
  0x6b   : > { %3707 = vmatpush3.bf16.msra.mxu1 %v3904_v16 }
  0x6c   : > { %3670 = vmatmul.mubr.msk.f32.gmra.mrb[2].mxu0 %vm764_vm1, %v4330_v31  ;;  %p4049_p13 = pneg %p4048_p12 }
  0x6d   : > { %3672 = vmatprep.mubr.msk.f32.mxu0 %vm764_vm1, %v4336_v34 }
  0x6e   : > { %p4056_p3 = pnand %p4055_p2, %p4049_p13 }
  0x70   : > { %3673 = vmatmul.mubr.msk.f32.gmra.mrb[4].mxu0 %vm764_vm1, %v4511_v28 }
  0x71   : > { %3675 = vmatprep.mubr.msk.f32.mxu0 %vm764_vm1, %v4527_v48 }
  0x74   : > { %3676 = vmatmul.mubr.msk.f32.gmra.mrb[6].mxu0 %vm764_vm1, %v1671_v8 }
  0x75   : > { %3680 = vmatprep.mubr.msk.f32.mxu0 %vm764_vm1, %v757_v49  ;;  %v3400_v49 = vld [vmem:[%s5138_s5] ss:$0 sm:$0xff] }
  0x78   : > { %3681 = vmatmul.mubr.msk.f32.vlgmr.msra.gmra.mrb[0].mxu0 %vm764_vm1, %v758_v51 }
  0x79   : > { %3693 = vmatpush3.msk.msra.mxu0 %vm789_vm0, %v747_v22  ;;  %3683 = vmatprep.mubr.msk.f32.mxu0 %vm764_vm1, %v759_v54 }
  0x7c   : > { %3684 = vmatmul.mubr.msk.f32.gmra.mrb[2].mxu0 %vm764_vm1, %v760_v57 }
  0x7d   : > { %3686 = vmatprep.mubr.msk.f32.mxu0 %vm764_vm1, %v761_v61 }
  0x80   : > { %3687 = vmatmul.mubr.msk.f32.gmra.mrb[4].mxu0 %vm764_vm1, %v762_v63 }
  0x81   : > { %3689 = vmatprep.mubr.msk.f32.mxu0 %vm764_vm1, %v763_v6 }
  0x84   : > { %3690 = vmatmul.mubr.msk.f32.gmra.mrb[6].mxu0 %vm764_vm1, %v1791_v14 }
  0x85   : > { %3694 = vmatprep.mubr.msk.f32.mxu0 %vm764_vm1, %v4328_v30 }
  0x88   : > { %3695 = vmatmul.mubr.msk.f32.vlgmr.msra.gmra.mrb[0].mxu0 %vm764_vm1, %v4334_v33 }
  0x89   : > { %3697 = vmatprep.mubr.msk.f32.mxu0 %vm764_vm1, %v4360_v39 }
  0x8c   : > { %3698 = vmatmul.mubr.msk.f32.gmra.mrb[2].mxu0 %vm764_vm1, %v4364_v42 }
  0x8d   : > { %3700 = vmatprep.mubr.msk.f32.mxu0 %vm764_vm1, %v4381_v46 }
  0x90   : > { %3701 = vmatmul.mubr.msk.f32.gmra.mrb[4].mxu0 %vm764_vm1, %v4536_v20 }
  0x91   : > { %3703 = vmatprep.mubr.msk.f32.mxu0 %vm764_vm1, %v1070_v38 }
  0x94   : > { %3704 = vmatmul.mubr.msk.f32.gmra.mrb[6].mxu0 %vm764_vm1, %v4486_v19 }
 0x112   : > { %v3598_v30 = vpop.f32.mrb[0].mxu1 }
 0x113   : > { %v991_v31 = vpop.f32.mrb[1].mxu1 }
 0x116   : > { %v3601_v33 = vpop.f32.mrb[2].mxu1 }
 0x117   : > { %v1001_v34 = vpop.f32.mrb[3].mxu1 }
 0x11a   : > { %v3604_v39 = vpop.f32.mrb[4].mxu1 }
 0x11b   : > { %v1011_v42 = vpop.f32.mrb[5].mxu1 }
 0x126   : > { %v3621_v44 = vpop.f32.mrb[6].mxu1 }
 0x127   : > { %v1186_v45 = vpop.f32.mrb[7].mxu1 }
 0x15b   : > { %v3696_v46 = vpop.f32.mrb[0].mxu0 }
 0x15c   : > { %v3797_v51 = vadd.f32 %v3696_v46, %v3598_v30  ;;  %v1987_v52 = vpop.f32.mrb[1].mxu0 }
 0x15d   : > { %v3798_v54 = vadd.f32 %v1987_v52, %v991_v31 }
 0x15e   : > { %v2042_v57 = vadd.f32 %v3797_v51, %v3400_v49 }
 0x15f   : > { %v2041_v58 = vadd.f32 %v3798_v54, %v3400_v49  ;;  %v3699_v61 = vpop.f32.mrb[2].mxu0 }
 0x160   : > { %v3402_v63 = vmul.f32 -1.442695, %v2042_v57  ;;  %v3799_v1 = vadd.f32 %v3699_v61, %v3601_v33  ;;  %v1997_v2 = vpop.f32.mrb[3].mxu0  ;;  %v2638_v61 = vld [vmem:[%s5143_s10 + $0x8] sm:$0xff] }
 0x161   : > { %v3401_v6 = vmul.f32 -1.442695, %v2041_v58  ;;  %v3800_v8 = vadd.f32 %v1997_v2, %v1001_v34 }
 0x162   : > { %3910 = vpow2.f32 %v3402_v63  ;;  %v2044_v17 = vadd.f32 %v3799_v1, %v3400_v49  ;;  %v2639_v63 = vld [vmem:[%s5143_s10 + $0x10] sm:$0xff]  ;;  %v5162_v1 = vmov 0.0|0.0  }
 0x163   : > { %3912 = vpow2.f32 %v3401_v6  ;;  %v2043_v19 = vadd.f32 %v3800_v8, %v3400_v49  ;;  %v3702_v28 = vpop.f32.mrb[4].mxu0  ;;  %3777 = vmatprep.subr.bf16.mxu1 %v5162_v1  ;;  %v2640_v6 = vld [vmem:[%s5143_s10 + $0x18] sm:$0xff] }
 0x164   : > { %v3404_v48 = vmul.f32 -1.442695, %v2044_v17  ;;  %v3801_v20 = vadd.f32 %v3702_v28, %v3604_v39  ;;  %v2007_v23 = vpop.f32.mrb[5].mxu0  ;;  %v3781_v8 = vpack.c.bf16 %v2640_v6, %v2639_v63 }
 0x165   : > { %v3403_v47 = vmul.f32 -1.442695, %v2043_v19  ;;  %v3802_v4 = vadd.f32 %v2007_v23, %v1011_v42 }
 0x166   : > { %3914 = vpow2.f32 %v3404_v48  ;;  %v2046_v7 = vadd.f32 %v3801_v20, %v3400_v49  ;;  %v2643_v48 = vld [vmem:[%s5143_s10 + $0x30] sm:$0xff]  ;;  %v2644_v20 = vld [vmem:[%s5143_s10 + $0x38] sm:$0xff] }
 0x167   : > { %3916 = vpow2.f32 %v3403_v47  ;;  %v2045_v24 = vadd.f32 %v3802_v4, %v3400_v49  ;;  %v3705_v25 = vpop.f32.mrb[6].mxu0  ;;  %v3787_v23 = vpack.c.bf16 %v2644_v20, %v2643_v48  ;;  %v3409_v47 = vld [vmem:[%s5140_s7] ss:$0 sm:$0xff] }
 0x168   : > { %v3406_v27 = vmul.f32 -1.442695, %v2046_v7  ;;  %v3803_v43 = vadd.f32 %v3705_v25, %v3621_v44  ;;  %v2017_v53 = vpop.f32.mrb[7].mxu0 }
 0x169   : > { %v3405_v0 = vmul.f32 -1.442695, %v2045_v24  ;;  %v3804_v29 = vadd.f32 %v2017_v53, %v1186_v45 }
 0x16a   : > { %3918 = vpow2.f32 %v3406_v27  ;;  %v2048_v32 = vadd.f32 %v3803_v43, %v3400_v49 }
 0x16b   : > { %3920 = vpow2.f32 %v3405_v0  ;;  %v2047_v35 = vadd.f32 %v3804_v29, %v3400_v49 }
 0x16c   : > { %v3911_v36 = vpop.eup %3910  ;;  %v3408_v37 = vmul.f32 -1.442695, %v2048_v32 }
 0x16d   : > { %v3913_v38 = vpop.eup %3912  ;;  %v2074_v55 = vadd.f32 1.0, %v3911_v36  ;;  %v3407_v40 = vmul.f32 -1.442695, %v2047_v35 }
 0x16e   : > { %v2073_v41 = vadd.f32 1.0, %v3913_v38  ;;  %3922 = vpow2.f32 %v3408_v37 }
 0x16f   : > { %3924 = vrcp.f32 %v2074_v55 }
 0x170   : > { %v3915_v59 = vpop.eup %3914  ;;  %3926 = vrcp.f32 %v2073_v41 }
 0x171   : > { %v3917_v3 = vpop.eup %3916  ;;  %v2076_v50 = vadd.f32 1.0, %v3915_v59  ;;  %3928 = vpow2.f32 %v3407_v40 }
 0x172   : > { %v2075_v60 = vadd.f32 1.0, %v3917_v3 }
 0x173   : > { %3930 = vrcp.f32 %v2076_v50 }
 0x174   : > { %v3919_v62 = vpop.eup %3918  ;;  %3932 = vrcp.f32 %v2075_v60 }
 0x175   : > { %v3921_v11 = vpop.eup %3920  ;;  %v2078_v12 = vadd.f32 1.0, %v3919_v62 }
 0x176   : > { %v2077_v13 = vadd.f32 1.0, %v3921_v11 }
 0x177   : > { %3934 = vrcp.f32 %v2078_v12 }
 0x178   : > { %v3923_v15 = vpop.eup %3922  ;;  %3936 = vrcp.f32 %v2077_v13 }
 0x179   : > { %v3925_v18 = vpop.eup %3924  ;;  %v2080_v26 = vadd.f32 1.0, %v3923_v15 }
 0x17a   : > { %v3927_v56 = vpop.eup %3926  ;;  %v4655_v5 = vmul.f32 %v3925_v18, %v2042_v57  ;;  %v5165_v57 = vmov 0.0   ;;  %v2299_v18 = vlaneseq }
 0x17b   : > { %v3929_v21 = vpop.eup %3928  ;;  %v4657_v10 = vmul.f32 %v3927_v56, %v2041_v58  ;;  %3938 = vrcp.f32 %v2080_v26  ;;  %2261 = vst.msk [vmem:[#allocation2 + $0x8] sm:$0x3] %vm2260_vm5, %v5165_v57  ;;  %2267 = vst.msk [vmem:[#allocation2 + $0x38] sm:$0x3] %vm2260_vm5, %v5165_v57  ;;  %v2637_v58 = vld [vmem:[%s5143_s10] sm:$0xff] }
 0x17c   : > { %v2079_v22 = vadd.f32 1.0, %v3929_v21  ;;  %2266 = vst.msk [vmem:[#allocation2 + $0x30] sm:$0xff] %vm2258_vm4, %v5165_v57  ;;  %2259 = vst.msk [vmem:[#allocation2] sm:$0xff] %vm2258_vm4, %v5165_v57  ;;  %v3778_v2 = vpack.c.bf16 %v2638_v61, %v2637_v58 }
 0x17d   : > { %v3931_v9 = vpop.eup %3930  ;;  %v2105_v14 = vpack.c.bf16 %v4655_v5, %v4657_v10  ;;  %2279 = vst.msk [vmem:[#allocation2 + $0x98] sm:$0x3] %vm2260_vm5, %v5165_v57  ;;  %2263 = vst.msk [vmem:[#allocation2 + $0x18] sm:$0x3] %vm2260_vm5, %v5165_v57 }
 0x17e   : > { %v3933_v16 = vpop.eup %3932  ;;  %v4661_v30 = vmul.f32 %v3931_v9, %v2044_v17  ;;  %3940 = vrcp.f32 %v2079_v22  ;;  %2262 = vst.msk [vmem:[#allocation2 + $0x10] sm:$0xff] %vm2258_vm4, %v5165_v57  ;;  %2264 = vst.msk [vmem:[#allocation2 + $0x20] sm:$0xff] %vm2258_vm4, %v5165_v57  ;;  %v2641_v17 = vld [vmem:[%s5143_s10 + $0x20] sm:$0xff] }
 0x17f   : > { %v4663_v31 = vmul.f32 %v3933_v16, %v2043_v19  ;;  %3708 = vmatprep.mubr.msk.bf16.mxu1 %vm2124_vm3, %v2105_v14  ;;  %2265 = vst.msk [vmem:[#allocation2 + $0x28] sm:$0x3] %vm2260_vm5, %v5165_v57  ;;  %2269 = vst.msk [vmem:[#allocation2 + $0x48] sm:$0x3] %vm2260_vm5, %v5165_v57  ;;  %v2642_v19 = vld [vmem:[%s5143_s10 + $0x28] sm:$0xff]  ;;  %v4769_v16 = vshrl.u32 %v2299_v18, 7 }
 0x180   : > { %2268 = vst.msk [vmem:[#allocation2 + $0x40] sm:$0xff] %vm2258_vm4, %v5165_v57  ;;  %2270 = vst.msk [vmem:[#allocation2 + $0x50] sm:$0xff] %vm2258_vm4, %v5165_v57  ;;  %v3784_v28 = vpack.c.bf16 %v2642_v19, %v2641_v17 }
 0x181   : > { %v3935_v33 = vpop.eup %3934  ;;  %v2106_v34 = vpack.c.bf16 %v4661_v30, %v4663_v31  ;;  %2271 = vst.msk [vmem:[#allocation2 + $0x58] sm:$0x3] %vm2260_vm5, %v5165_v57  ;;  %2273 = vst.msk [vmem:[#allocation2 + $0x68] sm:$0x3] %vm2260_vm5, %v5165_v57  ;;  %v2470_v18 = vsub.s32 6, %v4769_v16 }
 0x182   : > { %v3937_v39 = vpop.eup %3936  ;;  %v4668_v42 = vmul.f32 %v3935_v33, %v2046_v7  ;;  %2272 = vst.msk [vmem:[#allocation2 + $0x60] sm:$0xff] %vm2258_vm4, %v5165_v57  ;;  %2274 = vst.msk [vmem:[#allocation2 + $0x70] sm:$0xff] %vm2258_vm4, %v5165_v57  ;;  %v5164_v33 = vsub.s32 0, %v4769_v16 }
 0x183   : > { %v4670_v44 = vmul.f32 %v3937_v39, %v2045_v24  ;;  %3709 = vmatmul.mubr.msk.bf16.vlgmr.msra.gmra.mrb[8].mxu1 %vm2124_vm3, %v2106_v34  ;;  %2275 = vst.msk [vmem:[#allocation2 + $0x78] sm:$0x3] %vm2260_vm5, %v5165_v57  ;;  %2277 = vst.msk [vmem:[#allocation2 + $0x88] sm:$0x3] %vm2260_vm5, %v5165_v57  ;;  %v2329_v34 = vsub.s32 1, %v4769_v16  ;;  %v2319_v17 = vld [vmem:[#allocation2 + $0x1] sm:$0xff] }
 0x184   : > { %2276 = vst.msk [vmem:[#allocation2 + $0x80] sm:$0xff] %vm2258_vm4, %v5165_v57  ;;  %2278 = vst.msk [vmem:[#allocation2 + $0x90] sm:$0xff] %vm2258_vm4, %v5165_v57  ;;  %3779 = vmatpush3.bf16.msra.mxu1 %v3778_v2 }
 0x185   : > { %v3939_v45 = vpop.eup %3938  ;;  %v2107_v46 = vpack.c.bf16 %v4668_v42, %v4670_v44  ;;  %3780 = vmatprep.subr.bf16.mxu1 %v5162_v1 }
 0x186   : > { %v4675_v49 = vmul.f32 %v3939_v45, %v2048_v32  ;;  %v4776_v45 = vld [vmem:[%s5141_s8] sm:$0xff] }
 0x187   : > { %3712 = vmatprep.mubr.msk.bf16.mxu1 %vm2124_vm3, %v2107_v46  ;;  %v4782_v61 = vrot.slane %v4776_v45, %v5164_v33  ;;  %v4785_v63 = vrot.slane %v4776_v45, %v2329_v34 }
 0x188   : > { %v3941_v51 = vpop.eup %3940  ;;  %3782 = vmatpush3.bf16.msra.mxu1 %v3781_v8  ;;  %v2291_v8 = vld [vmem:[#allocation2] sm:$0xff] }
 0x189   : > { %v4678_v52 = vmul.f32 %v3941_v51, %v2047_v35  ;;  %3783 = vmatprep.subr.bf16.mxu1 %v5162_v1 }
 0x18b   : > { %v2108_v54 = vpack.c.bf16 %v4675_v49, %v4678_v52 }
 0x18c   : > { %3785 = vmatpush3.bf16.msra.mxu1 %v3784_v28 }
 0x18d   : > { %3713 = vmatmul.mubr.msk.bf16.gmra.mrb[12].mxu1 %vm2124_vm3, %v2108_v54  ;;  %3786 = vmatprep.subr.bf16.mxu1 %v5162_v1  ;;  %v2357_v54 = vsub.s32 2, %v4769_v16 }
 0x18e   : > { %3732 = vmatprep.mubr.msk.f32.mxu1 %vm4112_vm6, %v5165_v57 }
 0x18f   : > { %v4789_v20 = vrot.slane %v4776_v45, %v2357_v54 }
 0x190   : > { %3788 = vmatpush3.bf16.msra.mxu1 %v3787_v23 }
 0x191   : > { %3735 = vmatprep.subr.mxu1 %v5165_v57 }
 0x256   : > { %v3710_v4 = vpop.f32.mrb[8].mxu1 }
 0x257   : > { %v2180_v7 = vadd.f32 %v3710_v4, %v3409_v47  ;;  %v2171_v24 = vpop.f32.mrb[9].mxu1 }
 0x258   : > { %v2172_v25 = vadd.f32 %v3409_v47, %v2171_v24  ;;  %v3711_v27 = vpop.f32.mrb[10].mxu1  ;;  %v2303_v24 = vmul.f32 %v4782_v61, %v2291_v8 }
 0x259   : > { %v3417_v43 = vmul.f32 -1.442695, %v2180_v7  ;;  %v2183_v53 = vadd.f32 %v3711_v27, %v3409_v47  ;;  %v2174_v0 = vpop.f32.mrb[11].mxu1  ;;  %v2331_v27 = vmul.f32 %v4785_v63, %v2319_v17 }
 0x25a   : > { %v3415_v29 = vmul.f32 -1.442695, %v2172_v25  ;;  %v2175_v32 = vadd.f32 %v3409_v47, %v2174_v0  ;;  %v2347_v0 = vld [vmem:[#allocation2 + $0x2] sm:$0xff] }
 0x25b   : > { %3942 = vpow2.f32 %v3417_v43  ;;  %v3418_v35 = vmul.f32 -1.442695, %v2183_v53 }
 0x25c   : > { %3944 = vpow2.f32 %v3415_v29  ;;  %v3416_v36 = vmul.f32 -1.442695, %v2175_v32  ;;  %v2385_v29 = vsub.s32 3, %v4769_v16 }
 0x25d   : > { %3946 = vpow2.f32 %v3418_v35 }
 0x25e   : > { %3948 = vpow2.f32 %v3416_v36  ;;  %v2339_v36 = vadd.f32 %v2331_v27, %v2303_v24 }
 0x260   : > { %v3714_v37 = vpop.f32.mrb[12].mxu1 }
 0x261   : > { %v4757_v38 = vadd.f32 %v3714_v37, %v3409_v47  ;;  %v2187_v55 = vpop.f32.mrb[13].mxu1  ;;  %v2359_v37 = vmul.f32 %v4789_v20, %v2347_v0 }
 0x262   : > { %v4759_v40 = vadd.f32 %v3409_v47, %v2187_v55  ;;  %v3715_v41 = vpop.f32.mrb[14].mxu1 }
 0x263   : > { %v3421_v59 = vmul.f32 -1.442695, %v4757_v38  ;;  %v4762_v3 = vadd.f32 %v3715_v41, %v3409_v47  ;;  %v2190_v50 = vpop.f32.mrb[15].mxu1  ;;  %v4804_v41 = vrot.slane %v4776_v45, %v2385_v29 }
 0x264   : > { %v3419_v60 = vmul.f32 -1.442695, %v4759_v40  ;;  %v4765_v62 = vadd.f32 %v3409_v47, %v2190_v50 }
 0x265   : > { %v3943_v11 = vpop.eup %3942  ;;  %3950 = vpow2.f32 %v3421_v59  ;;  %v3422_v12 = vmul.f32 -1.442695, %v4762_v3  ;;  %v2441_v59 = vsub.s32 5, %v4769_v16 }
 0x266   : > { %v3945_v13 = vpop.eup %3944  ;;  %v2228_v15 = vadd.f32 1.0, %v3943_v11  ;;  %3952 = vpow2.f32 %v3419_v60  ;;  %v3420_v9 = vmul.f32 -1.442695, %v4765_v62 }
 0x267   : > { %v3947_v26 = vpop.eup %3946  ;;  %v2226_v56 = vadd.f32 1.0, %v3945_v13  ;;  %3954 = vpow2.f32 %v3422_v12 }
 0x268   : > { %v3949_v21 = vpop.eup %3948  ;;  %3956 = vrcp.f32 %v2228_v15  ;;  %v2229_v22 = vadd.f32 1.0, %v3947_v26 }
 0x269   : > { %3958 = vrcp.f32 %v2226_v56  ;;  %v2227_v14 = vadd.f32 1.0, %v3949_v21  ;;  %v2367_v56 = vadd.f32 %v2359_v37, %v2339_v36 }
 0x26a   : > { %3960 = vrcp.f32 %v2229_v22  ;;  %v2498_v22 = vsub.s32 7, %v4769_v16 }
 0x26b   : > { %3962 = vrcp.f32 %v2227_v14 }
 0x26c   : > { %3964 = vpow2.f32 %v3420_v9 }
 0x26f   : > { %v3951_v39 = vpop.eup %3950 }
 0x270   : > { %v3953_v46 = vpop.eup %3952  ;;  %v2232_v47 = vadd.f32 1.0, %v3951_v39  ;;  %v4823_v39 = vrot.slane %v4776_v45, %v2441_v59 }
 0x271   : > { %v3955_v51 = vpop.eup %3954  ;;  %v2230_v43 = vadd.f32 1.0, %v3953_v46 }
 0x272   : > { %v3957_v58 = vpop.eup %3956  ;;  %3966 = vrcp.f32 %v2232_v47  ;;  %v4835_v47 = vrot.slane %v4776_v45, %v2470_v18 }
 0x273   : > { %v3959_v2 = vpop.eup %3958  ;;  %v2252_v6 = vmul.f32 %v3957_v58, %v2180_v7  ;;  %3968 = vrcp.f32 %v2230_v43 }
 0x274   : > { %v3961_v19 = vpop.eup %3960  ;;  %v2250_v28 = vmul.f32 %v3959_v2, %v2172_v25  ;;  %v2233_v25 = vadd.f32 1.0, %v3955_v51 }
 0x275   : > { %v3963_v48 = vpop.eup %3962  ;;  %2283 = vst.msk [vmem:[#allocation2 + $0x31] sm:$0xff] %vm2258_vm4, %v2252_v6  ;;  %v2253_v23 = vmul.f32 %v3961_v19, %v2183_v53  ;;  %v2413_v53 = vsub.s32 4, %v4769_v16 }
 0x276   : > { %v3965_v4 = vpop.eup %3964  ;;  %2281 = vst.msk [vmem:[#allocation2 + $0x11] sm:$0xff] %vm2258_vm4, %v2250_v28  ;;  %v2251_v7 = vmul.f32 %v3963_v48, %v2175_v32  ;;  %3970 = vrcp.f32 %v2233_v25 }
 0x277   : > { %2284 = vst.msk [vmem:[#allocation2 + $0x41] sm:$0xff] %vm2258_vm4, %v2253_v23  ;;  %v2231_v35 = vadd.f32 1.0, %v3965_v4  ;;  %v4814_v15 = vrot.slane %v4776_v45, %v2413_v53  ;;  %v4838_v4 = vrot.slane %v4776_v45, %v2498_v22 }
 0x278   : > { %2282 = vst.msk [vmem:[#allocation2 + $0x21] sm:$0xff] %vm2258_vm4, %v2251_v7 }
 0x279   : > { %3972 = vrcp.f32 %v2231_v35 }
 0x27c   : > { %v4799_v55 = vld [vmem:[#allocation2 + $0x30] sm:$0xff]  ;;  %v3967_v48 = vpop.eup %3966 }
 0x27d   : > { %v4801_v32 = vld [vmem:[#allocation2 + $0x31] sm:$0xff]  ;;  %v2306_v50 = vmul.f32 %v4782_v61, %v4799_v55  ;;  %v2389_v23 = vmul.f32 %v4804_v41, %v4799_v55  ;;  %v3969_v7 = vpop.eup %3968 }
 0x27e   : > { %v2334_v60 = vmul.f32 %v4785_v63, %v4801_v32  ;;  %v4811_v11 = vld [vmem:[#allocation2 + $0x32] sm:$0xff]  ;;  %v4827_v58 = vld [vmem:[#allocation2 + $0x40] sm:$0xff] }
 0x27f   : > { %v2292_v12 = vld [vmem:[#allocation2 + $0x10] sm:$0xff]  ;;  %v2362_v34 = vmul.f32 %v4789_v20, %v4811_v11  ;;  %v2293_v2 = vld [vmem:[#allocation2 + $0x20] sm:$0xff]  ;;  %v2390_v25 = vmul.f32 %v4804_v41, %v4827_v58  ;;  %v2307_v53 = vmul.f32 %v4782_v61, %v4827_v58 }
 0x280   : > { %v2320_v13 = vld [vmem:[#allocation2 + $0x11] sm:$0xff]  ;;  %v2342_v21 = vadd.f32 %v2334_v60, %v2306_v50  ;;  %v2304_v9 = vmul.f32 %v4782_v61, %v2292_v12  ;;  %v2387_v46 = vmul.f32 %v4804_v41, %v2292_v12  ;;  %v4830_v19 = vld [vmem:[#allocation2 + $0x41] sm:$0xff]  ;;  %v2305_v29 = vmul.f32 %v4782_v61, %v2293_v2  ;;  %v3971_v35 = vpop.eup %3970 }
 0x281   : > { %v2348_v26 = vld [vmem:[#allocation2 + $0x12] sm:$0xff]  ;;  %v2332_v14 = vmul.f32 %v4785_v63, %v2320_v13  ;;  %v2415_v17 = vmul.f32 %v4814_v15, %v2320_v13  ;;  %v2321_v28 = vld [vmem:[#allocation2 + $0x21] sm:$0xff]  ;;  %v2335_v36 = vmul.f32 %v4785_v63, %v4830_v19  ;;  %v2388_v37 = vmul.f32 %v4804_v41, %v2293_v2 }
 0x282   : > { %v2360_v54 = vmul.f32 %v4789_v20, %v2348_v26  ;;  %v2370_v6 = vadd.f32 %v2362_v34, %v2342_v21  ;;  %v2395_v8 = vadd.f32 %v2387_v46, %v2367_v56  ;;  %v2349_v27 = vld [vmem:[#allocation2 + $0x22] sm:$0xff]  ;;  %v2443_v0 = vmul.f32 %v4823_v39, %v2348_v26 }
 0x283   : > { %v2340_v51 = vadd.f32 %v2332_v14, %v2304_v9  ;;  %v2333_v45 = vmul.f32 %v4785_v63, %v2321_v28  ;;  %v3973_v59 = vpop.eup %3972  ;;  %v2361_v12 = vmul.f32 %v4789_v20, %v2349_v27  ;;  %v2416_v13 = vmul.f32 %v4814_v15, %v2321_v28 }
 0x284   : > { %v2423_v43 = vadd.f32 %v2415_v17, %v2395_v8  ;;  %v2398_v60 = vadd.f32 %v2390_v25, %v2370_v6  ;;  %v2444_v56 = vmul.f32 %v4823_v39, %v2349_v27  ;;  %v2472_v21 = vmul.f32 %v4835_v47, %v2293_v2  ;;  %v2467_v8 = vld [vmem:[#allocation2 + $0x90] sm:$0xff]  ;;  %v4862_v17 = vld [vmem:[%s5141_s8 + $0x8] ss:$0 sm:$0xff] }
 0x285   : > { %v2368_v24 = vadd.f32 %v2360_v54, %v2340_v51  ;;  %v2341_v18 = vadd.f32 %v2333_v45, %v2305_v29  ;;  %v2500_v22 = vmul.f32 %v4838_v4, %v2321_v28  ;;  %v2256_v9 = vmul.f32 %v3967_v48, %v4757_v38  ;;  %v4883_v29 = vld [vmem:[%s5142_s9] ss:$0 sm:$0xff]  ;;  %v2523_v45 = vld [vmem:[#allocation2 + $0x92] sm:$0xff] }
 0x286   : > { %v2451_v50 = vadd.f32 %v2443_v0, %v2423_v43  ;;  %v2254_v14 = vmul.f32 %v3969_v7, %v4759_v40  ;;  %v2257_v34 = vmul.f32 %v3971_v35, %v4762_v3  ;;  %v2255_v6 = vmul.f32 %v3973_v59, %v4765_v62  ;;  %v2351_v3 = vld [vmem:[#allocation2 + $0x42] sm:$0xff] }
 0x287   : > { %v2396_v26 = vadd.f32 %v2388_v37, %v2368_v24  ;;  %v2369_v46 = vadd.f32 %v2361_v12, %v2341_v18  ;;  %v2417_v2 = vmul.f32 %v4814_v15, %v4801_v32  ;;  %v2473_v38 = vmul.f32 %v4835_v47, %v4799_v55  ;;  %2287 = vst.msk [vmem:[#allocation2 + $0x71] sm:$0xff] %vm2258_vm4, %v2256_v9  ;;  %v2495_v24 = vld [vmem:[#allocation2 + $0x91] sm:$0xff] }
 0x288   : > { %v2480_v54 = vadd.f32 %v2472_v21, %v2451_v50  ;;  %v2418_v40 = vmul.f32 %v4814_v15, %v4830_v19  ;;  %2285 = vst.msk [vmem:[#allocation2 + $0x51] sm:$0xff] %vm2258_vm4, %v2254_v14  ;;  %2288 = vst.msk [vmem:[#allocation2 + $0x81] sm:$0xff] %vm2258_vm4, %v2257_v34  ;;  %v2528_v48 = vmul.f32 %v4862_v17, %v2349_v27 }
 0x289   : > { %v2424_v51 = vadd.f32 %v2416_v13, %v2396_v26  ;;  %v2397_v62 = vadd.f32 %v2389_v23, %v2369_v46  ;;  %2286 = vst.msk [vmem:[#allocation2 + $0x61] sm:$0xff] %vm2258_vm4, %v2255_v6  ;;  %v2445_v55 = vmul.f32 %v4823_v39, %v4811_v11  ;;  %v2343_v43 = vadd.f32 %v2335_v36, %v2307_v53 }
 0x28a   : > { %v2508_v7 = vadd.f32 %v2500_v22, %v2480_v54  ;;  %v2426_v0 = vadd.f32 %v2418_v40, %v2398_v60  ;;  %v4878_v25 = vmul.f32 %v4835_v47, %v2467_v8  ;;  %v2501_v23 = vmul.f32 %v4838_v4, %v4801_v32 }
 0x28b   : > { %v2452_v28 = vadd.f32 %v2444_v56, %v2424_v51  ;;  %v2425_v27 = vadd.f32 %v2417_v2, %v2397_v62  ;;  %v2529_v59 = vmul.f32 %v4862_v17, %v4811_v11  ;;  %v2363_v53 = vmul.f32 %v4789_v20, %v2351_v3 }
 0x28c   : > { %v2536_v37 = vadd.f32 %v2528_v48, %v2508_v7  ;;  %v2446_v36 = vmul.f32 %v4823_v39, %v2351_v3  ;;  %v4892_v50 = vmul.f32 %v4838_v4, %v2495_v24  ;;  %v2474_v60 = vmul.f32 %v4835_v47, %v4827_v58 }
 0x28d   : > { %v2481_v35 = vadd.f32 %v2473_v38, %v2452_v28  ;;  %v2453_v12 = vadd.f32 %v2445_v55, %v2425_v27  ;;  %v2371_v18 = vadd.f32 %v2363_v53, %v2343_v43  ;;  %v4901_v26 = vmul.f32 %v4838_v4, %v4830_v19 }
 0x28e   : > { %v4897_v32 = vadd.f32 %v4883_v29, %v2536_v37  ;;  %v2454_v11 = vadd.f32 %v2446_v36, %v2426_v0  ;;  %v4904_v56 = vmul.f32 %v4862_v17, %v2523_v45  ;;  %v2298_v21 = vld [vmem:[#allocation2 + $0x70] sm:$0xff]  ;;  %v4909_v58 = vmul.f32 %v4862_v17, %v2351_v3 }
 0x28f   : > { %v2509_v13 = vadd.f32 %v2501_v23, %v2481_v35  ;;  %v2326_v22 = vld [vmem:[#allocation2 + $0x71] sm:$0xff]  ;;  %v2482_v14 = vadd.f32 %v2474_v60, %v2453_v12  ;;  %v2310_v19 = vmul.f32 %v4782_v61, %v2298_v21  ;;  %v2393_v6 = vmul.f32 %v4804_v41, %v2298_v21  ;;  %v2382_v48 = vld [vmem:[#allocation2 + $0x80] sm:$0xff] }
 0x290   : > { %v4906_v9 = vld [vmem:[#allocation2 + $0x72] sm:$0xff]  ;;  %v4914_v46 = vmul.f32 -1.442695, %v4897_v32  ;;  %v2338_v51 = vmul.f32 %v4785_v63, %v2326_v22  ;;  %v2297_v24 = vld [vmem:[#allocation2 + $0x60] sm:$0xff] }
 0x291   : > { %v4911_v34 = vadd.f32 %v2529_v59, %v2509_v13  ;;  %v2366_v54 = vmul.f32 %v4789_v20, %v4906_v9  ;;  %v2296_v8 = vld [vmem:[#allocation2 + $0x50] sm:$0xff]  ;;  %v2325_v7 = vld [vmem:[#allocation2 + $0x61] sm:$0xff]  ;;  %v2309_v23 = vmul.f32 %v4782_v61, %v2297_v24  ;;  %v2392_v36 = vmul.f32 %v4804_v41, %v2297_v24 }
 0x292   : > { %v2324_v2 = vld [vmem:[#allocation2 + $0x51] sm:$0xff]  ;;  %v2308_v40 = vmul.f32 %v4782_v61, %v2296_v8  ;;  %v2391_v28 = vmul.f32 %v4804_v41, %v2296_v8  ;;  %v2475_v0 = vmul.f32 %v4835_v47, %v2296_v8  ;;  %v2353_v27 = vld [vmem:[#allocation2 + $0x62] sm:$0xff]  ;;  %v2337_v59 = vmul.f32 %v4785_v63, %v2325_v7 }
 0x293   : > { %v2352_v38 = vld [vmem:[#allocation2 + $0x52] sm:$0xff]  ;;  %v2336_v3 = vmul.f32 %v4785_v63, %v2324_v2  ;;  %v2419_v55 = vmul.f32 %v4814_v15, %v2324_v2  ;;  %v2410_v35 = vld [vmem:[#allocation2 + $0x81] sm:$0xff]  ;;  %v2365_v53 = vmul.f32 %v4789_v20, %v2353_v27  ;;  %v2420_v60 = vmul.f32 %v4814_v15, %v2325_v7 }
 0x294   : > { %v2364_v62 = vmul.f32 %v4789_v20, %v2352_v38  ;;  %v2447_v43 = vmul.f32 %v4823_v39, %v2352_v38  ;;  %v2399_v37 = vadd.f32 %v2391_v28, %v2371_v18  ;;  %v2346_v12 = vadd.f32 %v2338_v51, %v2310_v19  ;;  %v2438_v1 = vld [vmem:[#allocation2 + $0x82] sm:$0xff] }
 0x295   : > { %v2344_v45 = vadd.f32 %v2336_v3, %v2308_v40  ;;  %v2394_v13 = vmul.f32 %v4804_v41, %v2382_v48  ;;  %v2345_v8 = vadd.f32 %v2337_v59, %v2309_v23  ;;  %v2421_v61 = vmul.f32 %v4814_v15, %v2326_v22 }
 0x296   : > { %v2422_v57 = vmul.f32 %v4814_v15, %v2410_v35  ;;  %v2374_v40 = vadd.f32 %v2366_v54, %v2346_v12  ;;  %v2427_v18 = vadd.f32 %v2419_v55, %v2399_v37  ;;  %v2448_v63 = vmul.f32 %v4823_v39, %v2353_v27 }
 0x297   : > { %v2372_v33 = vadd.f32 %v2364_v62, %v2344_v45  ;;  %v2449_v20 = vmul.f32 %v4823_v39, %v4906_v9  ;;  %v2373_v3 = vadd.f32 %v2365_v53, %v2345_v8  ;;  %v2450_v19 = vmul.f32 %v4823_v39, %v2438_v1 }
 0x298   : > { %v2476_v41 = vmul.f32 %v4835_v47, %v2297_v24  ;;  %v2402_v51 = vadd.f32 %v2394_v13, %v2374_v40  ;;  %v2455_v62 = vadd.f32 %v2447_v43, %v2427_v18  ;;  %v2477_v23 = vmul.f32 %v4835_v47, %v2298_v21 }
 0x299   : > { %v2400_v28 = vadd.f32 %v2392_v36, %v2372_v33  ;;  %v2478_v45 = vmul.f32 %v4835_v47, %v2382_v48  ;;  %v2401_v15 = vadd.f32 %v2393_v6, %v2373_v3  ;;  %v2483_v55 = vadd.f32 %v2475_v0, %v2454_v11 }
 0x29a   : > { %v2503_v37 = vmul.f32 %v4838_v4, %v2324_v2  ;;  %v2430_v59 = vadd.f32 %v2422_v57, %v2402_v51  ;;  %v2484_v12 = vadd.f32 %v2476_v41, %v2455_v62  ;;  %v2504_v53 = vmul.f32 %v4838_v4, %v2325_v7 }
 0x29b   : > { %v2428_v54 = vadd.f32 %v2420_v60, %v2400_v28  ;;  %v2505_v33 = vmul.f32 %v4838_v4, %v2326_v22  ;;  %v2429_v39 = vadd.f32 %v2421_v61, %v2401_v15  ;;  %v2506_v24 = vmul.f32 %v4838_v4, %v2410_v35 }
 0x29c   : > { %v2510_v43 = vadd.f32 %v4901_v26, %v2482_v14  ;;  %v2458_v21 = vadd.f32 %v2450_v19, %v2430_v59  ;;  %v2511_v13 = vadd.f32 %v2503_v37, %v2483_v55  ;;  %v2512_v47 = vadd.f32 %v2504_v53, %v2484_v12 }
 0x29d   : > { %v2456_v36 = vadd.f32 %v2448_v63, %v2428_v54  ;;  %v2531_v6 = vmul.f32 %v4862_v17, %v2352_v38  ;;  %v2457_v11 = vadd.f32 %v2449_v20, %v2429_v39  ;;  %v2532_v57 = vmul.f32 %v4862_v17, %v2353_v27 }
 0x29e   : > { %v2533_v2 = vmul.f32 %v4862_v17, %v4906_v9  ;;  %v2487_v22 = vadd.f32 %v4878_v25, %v2458_v21  ;;  %v2534_v7 = vmul.f32 %v4862_v17, %v2438_v1  ;;  %v2538_v4 = vadd.f32 %v4909_v58, %v2510_v43 }
 0x29f   : > { %v2485_v48 = vadd.f32 %v2477_v23, %v2456_v36  ;;  %v2539_v0 = vadd.f32 %v2531_v6, %v2511_v13  ;;  %v2486_v26 = vadd.f32 %v2478_v45, %v2457_v11  ;;  %v2540_v35 = vadd.f32 %v2532_v57, %v2512_v47 }
 0x2a0   : > { %v2552_v38 = vadd.f32 %v4883_v29, %v4911_v34  ;;  %v2515_v60 = vadd.f32 %v4892_v50, %v2487_v22  ;;  %v2553_v27 = vadd.f32 %v4883_v29, %v2538_v4  ;;  %3974 = vpow2.f32 %v4914_v46 }
 0x2a1   : > { %v2513_v14 = vadd.f32 %v2505_v33, %v2485_v48  ;;  %v2554_v8 = vadd.f32 %v4883_v29, %v2539_v0  ;;  %v2514_v25 = vadd.f32 %v2506_v24, %v2486_v26  ;;  %v2555_v1 = vadd.f32 %v4883_v29, %v2540_v35 }
 0x2a2   : > { %v3426_v17 = vmul.f32 -1.442695, %v2552_v38  ;;  %v2543_v58 = vadd.f32 %v4904_v56, %v2515_v60  ;;  %v3427_v61 = vmul.f32 -1.442695, %v2553_v27 }
 0x2a3   : > { %v2541_v9 = vadd.f32 %v2533_v2, %v2513_v14  ;;  %v3428_v40 = vmul.f32 -1.442695, %v2554_v8  ;;  %v2542_v18 = vadd.f32 %v2534_v7, %v2514_v25  ;;  %v3429_v50 = vmul.f32 -1.442695, %v2555_v1 }
 0x2a4   : > { %3976 = vpow2.f32 %v3426_v17  ;;  %v2558_v63 = vadd.f32 %v4883_v29, %v2543_v58 }
 0x2a5   : > { %v2556_v34 = vadd.f32 %v4883_v29, %v2541_v9  ;;  %3978 = vpow2.f32 %v3427_v61  ;;  %v2557_v20 = vadd.f32 %v4883_v29, %v2542_v18 }
 0x2a6   : > { %3980 = vpow2.f32 %v3428_v40  ;;  %v3432_v3 = vmul.f32 -1.442695, %v2558_v63 }
 0x2a7   : > { %v3430_v46 = vmul.f32 -1.442695, %v2556_v34  ;;  %3982 = vpow2.f32 %v3429_v50  ;;  %v3431_v28 = vmul.f32 -1.442695, %v2557_v20 }
 0x2a9   : > { %3984 = vpow2.f32 %v3430_v46 }
 0x2aa   : > { %3986 = vpow2.f32 %v3432_v3  ;;  %v3975_v56 = vpop.eup %3974 }
 0x2ab   : > { %3988 = vpow2.f32 %v3431_v28  ;;  %v2583_v19 = vadd.f32 1.0, %v3975_v56  ;;  %v2726_v56 = vld [vmem:[%s5145_s12] sm:$0xf] }
 0x2ad   : > { %3990 = vrcp.f32 %v2583_v19  ;;  %v2645_v19 = vld [vmem:[%s5144_s11] sm:$0x1] }
 0x2ae   : > { %v3977_v41 = vpop.eup %3976 }
 0x2af   : > { %v3979_v51 = vpop.eup %3978  ;;  %v2584_v62 = vadd.f32 1.0, %v3977_v41 }
 0x2b0   : > { %v3981_v23 = vpop.eup %3980  ;;  %v2585_v45 = vadd.f32 1.0, %v3979_v51 }
 0x2b1   : > { %v3983_v15 = vpop.eup %3982  ;;  %v2586_v54 = vadd.f32 1.0, %v3981_v23  ;;  %3992 = vrcp.f32 %v2584_v62 }
 0x2b2   : > { %v2587_v55 = vadd.f32 1.0, %v3983_v15  ;;  %3994 = vrcp.f32 %v2585_v45 }
 0x2b3   : > { %v3985_v29 = vpop.eup %3984  ;;  %3996 = vrcp.f32 %v2586_v54 }
 0x2b4   : > { %v3987_v37 = vpop.eup %3986  ;;  %v2588_v59 = vadd.f32 1.0, %v3985_v29  ;;  %3998 = vrcp.f32 %v2587_v55  ;;  %v3905_v55 = vld [vmem:[%s5147_s14] sm:$0xff]  }
 0x2b5   : > { %v3989_v12 = vpop.eup %3988  ;;  %v2590_v33 = vadd.f32 1.0, %v3987_v37  ;;  %v3906_v37 = vld [vmem:[%s5147_s14 + $0x8] sm:$0xff]  }
 0x2b6   : > { %v2589_v53 = vadd.f32 1.0, %v3989_v12  ;;  %4000 = vrcp.f32 %v2588_v59  ;;  %v3907_v59 = vld [vmem:[%s5147_s14 + $0x10] sm:$0xff]   ;;  %v3908_v12 = vld [vmem:[%s5147_s14 + $0x18] sm:$0xff]  }
 0x2b7   : > { %v3991_v39 = vpop.eup %3990 }
 0x2b8   : > { %4002 = vrcp.f32 %v2589_v53  ;;  %v4967_v36 = vmul.f32 %v3991_v39, %v4897_v32  ;;  %v3909_v53 = vld [vmem:[%s5149_s16] sm:$0xff]  }
 0x2b9   : > { %4004 = vrcp.f32 %v2590_v33  ;;  %v2727_v33 = vld [vmem:[%s5146_s13] sm:$0x1] }
 0x2ba   : > { %v2615_v48 = vsel %vm2258_vm4, %v4967_v36, 0.0 }
 0x2bb   : > { %v3993_v24 = vpop.eup %3992 }
 0x2bc   : > { %v3995_v43 = vpop.eup %3994  ;;  %v4969_v21 = vmul.f32 %v3993_v24, %v2552_v38 }
 0x2bd   : > { %v3997_v13 = vpop.eup %3996  ;;  %v4971_v47 = vmul.f32 %v3995_v43, %v2553_v27 }
 0x2be   : > { %v3999_v6 = vpop.eup %3998  ;;  %v4973_v11 = vmul.f32 %v3997_v13, %v2554_v8  ;;  %v2616_v57 = vsel %vm2258_vm4, %v4969_v21, 0.0 }
 0x2bf   : > { %v2617_v22 = vadd.f32 %v2616_v57, %v2615_v48  ;;  %v2618_v32 = vsel %vm2258_vm4, %v4971_v47, 0.0  ;;  %v4981_v7 = vmul.f32 %v3999_v6, %v2555_v1 }
 0x2c0   : > { %v4001_v2 = vpop.eup %4000  ;;  %v2620_v35 = vsel %vm2258_vm4, %v4973_v11, 0.0 }
 0x2c1   : > { %v4983_v4 = vmul.f32 %v4001_v2, %v2556_v34  ;;  %v2619_v26 = vadd.f32 %v2618_v32, %v2617_v22  ;;  %v2622_v27 = vsel %vm2258_vm4, %v4981_v7, 0.0  ;;  %v5187_v2 = vsub.s32 0, %v4769_v16 }
 0x2c2   : > { %v4003_v0 = vpop.eup %4002 }
 0x2c3   : > { %v4985_v14 = vmul.f32 %v4003_v0, %v2557_v20  ;;  %v4005_v38 = vpop.eup %4004  ;;  %v2621_v60 = vadd.f32 %v2620_v35, %v2619_v26  ;;  %v2624_v8 = vsel %vm2258_vm4, %v4983_v4, 0.0 }
 0x2c4   : > { %v4993_v9 = vmul.f32 %v4005_v38, %v2558_v63  ;;  %v5186_v63 = vmov 0.0  }
 0x2c5   : > { %v2623_v25 = vadd.f32 %v2622_v27, %v2621_v60  ;;  %v2626_v1 = vsel %vm2258_vm4, %v4985_v14, 0.0 }
 0x2c6   : > { %v2628_v61 = vsel %vm2258_vm4, %v4993_v9, 0.0 }
 0x2c7   : > { %v2625_v17 = vadd.f32 %v2624_v8, %v2623_v25 }
 0x2c9   : > { %v2627_v58 = vadd.f32 %v2626_v1, %v2625_v17 }
 0x2cb   : > { %v2629_v40 = vadd.f32 %v2628_v61, %v2627_v58 }
 0x2cd   : > { %v2630_v18 = vrot.slane %v2629_v40, 4 }
 0x2cf   : > { %v2631_v34 = vadd.f32 %v2630_v18, %v2629_v40 }
 0x2d1   : > { %v2632_v50 = vrot.slane %v2631_v34, 2 }
 0x2d3   : > { %v2633_v20 = vadd.f32 %v2632_v50, %v2631_v34 }
 0x2d5   : > { %v2634_v46 = vrot.slane %v2633_v20, 1 }
 0x2d7   : > { %v2635_v3 = vadd.f32 %v2634_v46, %v2633_v20 }
 0x2d9   : > { %v2636_v28 = vmul.f32 0.015625, %v2635_v3 }
 0x2db   : > { %3733 = vmatmul.mubr.msk.f32.vlgmr.msra.gmra.mrb[16].mxu1 %vm2258_vm4, %v2636_v28 }
 0x2dc   : > { %3737 = vmatprep.mubr.msk.f32.mxu1 %vm4112_vm6, %v5186_v63  ;;  %3736 = vmatpush3.msk.msra.mxu1 %vm2732_vm7, %v2726_v56 }
 0x2dd   : > { %3740 = vmatprep.subr.bf16.mxu1 %v3905_v55 }
 0x3ae   : > { %v2715_v41 = vpop.f32.mrb[16].mxu1 }
 0x3af   : > { %v2716_v51 = vadd.f32 %v2715_v41, %v2645_v19  ;;  %v3734_v62 = vpop.f32.mrb[17].mxu1 }
 0x3b1   : > { %v3434_v23 = vmul.f32 -1.442695, %v2716_v51 }
 0x3b3   : > { %4006 = vpow2.f32 %v3434_v23 }
 0x3bd   : > { %v4007_v45 = vpop.eup %4006 }
 0x3be   : > { %v2722_v15 = vadd.f32 1.0, %v4007_v45 }
 0x3c0   : > { %4008 = vrcp.f32 %v2722_v15 }
 0x3ca   : > { %v4009_v54 = vpop.eup %4008 }
 0x3cb   : > { %v2725_v29 = vmul.f32 %v4009_v54, %v2716_v51  ;;  %v3127_v54 = vld [vmem:[%s5151_s18] sm:$0xff] }
 0x3cd   : > { %3738 = vmatmul.mubr.msk.f32.vlgmr.msra.gmra.mrb[18].mxu1 %vm2728_vm8, %v2725_v29 }
 0x3ce   : > { %3741 = vmatpush3.bf16.msra.mxu1 %v3905_v55 }
 0x3cf   : > { %3742 = vmatprep.subr.bf16.mxu1 %v3906_v37 }
 0x3d2   : > { %3743 = vmatpush3.bf16.msra.mxu1 %v3906_v37 }
 0x3d3   : > { %3744 = vmatprep.subr.bf16.mxu1 %v3907_v59 }
 0x3d6   : > { %3745 = vmatpush3.bf16.msra.mxu1 %v3907_v59 }
 0x3d7   : > { %3746 = vmatprep.subr.bf16.mxu1 %v3908_v12 }
 0x3da   : > { %3747 = vmatpush3.bf16.msra.mxu1 %v3908_v12 }
 0x3db   : > { %3756 = vmatprep.subr.bf16.mxu1 %v3909_v53 }
 0x4a0   : > { %v2802_v39 = vpop.f32.mrb[18].mxu1 }
 0x4a1   : > { %v2803_v24 = vadd.f32 %v2802_v39, %v2727_v33  ;;  %v3739_v43 = vpop.f32.mrb[19].mxu1 }
 0x4a3   : > { %v3437_v13 = vmul.f32 -1.442695, %v2803_v24 }
 0x4a5   : > { %4010 = vpow2.f32 %v3437_v13 }
 0x4af   : > { %v4011_v6 = vpop.eup %4010 }
 0x4b0   : > { %v2809_v48 = vadd.f32 1.0, %v4011_v6 }
 0x4b2   : > { %4012 = vrcp.f32 %v2809_v48 }
 0x4bc   : > { %v4013_v57 = vpop.eup %4012 }
 0x4bd   : > { %v2815_v22 = vrot.slane %v4013_v57, %v5187_v2 }
 0x4bf   : > { %v2816_v32 = vmul.f32 %v2815_v22, %v4967_v36  ;;  %v2817_v0 = vmul.f32 %v2815_v22, %v4969_v21  ;;  %v2818_v26 = vmul.f32 %v2815_v22, %v4971_v47  ;;  %v2819_v35 = vmul.f32 %v2815_v22, %v4973_v11  ;;  %v3438_v11 = vld [vmem:[%s5148_s15] ss:$0 sm:$0xff] }
 0x4c0   : > { %v2820_v38 = vmul.f32 %v2815_v22, %v4981_v7  ;;  %v2821_v60 = vmul.f32 %v2815_v22, %v4983_v4  ;;  %v2822_v16 = vmul.f32 %v2815_v22, %v4985_v14  ;;  %v2823_v36 = vmul.f32 %v2815_v22, %v4993_v9 }
 0x4c1   : > { %v2824_v27 = vpack.c.bf16 %v2817_v0, %v2816_v32  ;;  %v2825_v8 = vpack.c.bf16 %v2819_v35, %v2818_v26  ;;  %v5188_v21 = vmov 0.0|0.0  }
 0x4c2   : > { %v2826_v25 = vpack.c.bf16 %v2821_v60, %v2820_v38  ;;  %v2827_v47 = vpack.c.bf16 %v2823_v36, %v2822_v16 }
 0x4c3   : > { %3748 = vmatprep.mubr.msk.bf16.mxu1 %vm2258_vm4, %v2824_v27 }
 0x4c4   : > { %3749 = vmatmul.mubr.msk.bf16.vlgmr.msra.gmra.mrb[20].mxu1 %vm2258_vm4, %v2825_v8 }
 0x4c5   : > { %3752 = vmatprep.mubr.msk.bf16.mxu1 %vm2258_vm4, %v2826_v25  ;;  %3757 = vmatpush3.bf16.msra.mxu1 %v3909_v53 }
 0x4c6   : > { %3789 = vmatprep.subr.bf16.mxu1 %v5188_v21 }
 0x4cc   : > { %3753 = vmatmul.mubr.msk.bf16.gmra.mrb[24].mxu1 %vm2258_vm4, %v2827_v47 }
 0x597   : > { %v3750_v7 = vpop.f32.mrb[20].mxu1 }
 0x598   : > { %v2922_v4 = vadd.f32 %v3750_v7, %v3438_v11  ;;  %v2913_v1 = vpop.f32.mrb[21].mxu1 }
 0x599   : > { %v2914_v17 = vadd.f32 %v3438_v11, %v2913_v1  ;;  %v3751_v58 = vpop.f32.mrb[22].mxu1 }
 0x59a   : > { %v2925_v61 = vadd.f32 %v3751_v58, %v3438_v11  ;;  %v2916_v40 = vpop.f32.mrb[23].mxu1  ;;  %v2946_v14 = vadd.f32 %v2922_v4, %v4663_v31 }
 0x59b   : > { %v2917_v18 = vadd.f32 %v3438_v11, %v2916_v40  ;;  %v2944_v34 = vadd.f32 %v2914_v17, %v4657_v10 }
 0x59c   : > { %v2947_v9 = vadd.f32 %v2925_v61, %v4661_v30 }
 0x59d   : > { %v2945_v50 = vadd.f32 %v2917_v18, %v4655_v5 }
 0x59e   : > { %v2953_v20 = vpack.c.bf16 %v2947_v9, %v2946_v14 }
 0x59f   : > { %v2952_v46 = vpack.c.bf16 %v2945_v50, %v2944_v34  ;;  %v3754_v3 = vpop.f32.mrb[24].mxu1 }
 0x5a0   : > { %v2938_v28 = vadd.f32 %v3754_v3, %v3438_v11  ;;  %v2929_v56 = vpop.f32.mrb[25].mxu1 }
 0x5a1   : > { %v2930_v19 = vadd.f32 %v3438_v11, %v2929_v56  ;;  %v3755_v41 = vpop.f32.mrb[26].mxu1  ;;  %3758 = vmatprep.mubr.msk.bf16.mxu1 %vm2124_vm3, %v2952_v46 }
 0x5a2   : > { %v2941_v51 = vadd.f32 %v3755_v41, %v3438_v11  ;;  %v2932_v62 = vpop.f32.mrb[27].mxu1  ;;  %3759 = vmatmul.mubr.msk.bf16.vlgmr.msra.gmra.mrb[28].mxu1 %vm2124_vm3, %v2953_v20  ;;  %v2950_v30 = vadd.f32 %v2938_v28, %v4678_v52  ;;  %v3130_v52 = vld [vmem:[%s5151_s18 + $0x18] sm:$0xff] }
 0x5a3   : > { %v2933_v31 = vadd.f32 %v3438_v11, %v2932_v62  ;;  %v2948_v5 = vadd.f32 %v2930_v19, %v4670_v44 }
 0x5a4   : > { %v2951_v10 = vadd.f32 %v2941_v51, %v4675_v49  ;;  %v3128_v49 = vld [vmem:[%s5151_s18 + $0x8] sm:$0xff] }
 0x5a5   : > { %v2949_v23 = vadd.f32 %v2933_v31, %v4668_v42  ;;  %v3129_v42 = vld [vmem:[%s5151_s18 + $0x10] sm:$0xff]  ;;  %v3790_v44 = vpack.c.bf16 %v3128_v49, %v3127_v54 }
 0x5a6   : > { %v2955_v45 = vpack.c.bf16 %v2951_v10, %v2950_v30  ;;  %v3793_v29 = vpack.c.bf16 %v3130_v52, %v3129_v42 }
 0x5a7   : > { %v2954_v15 = vpack.c.bf16 %v2949_v23, %v2948_v5  ;;  %3791 = vmatpush3.bf16.msra.mxu1 %v3790_v44 }
 0x5a8   : > { %3792 = vmatprep.subr.bf16.mxu1 %v5188_v21 }
 0x5a9   : > { %3762 = vmatprep.mubr.msk.bf16.mxu1 %vm2124_vm3, %v2954_v15 }
 0x5aa   : > { %3763 = vmatmul.mubr.msk.bf16.gmra.mrb[32].mxu1 %vm2124_vm3, %v2955_v45 }
 0x5ab   : > { %3774 = vmatprep.mubr.msk.f32.mxu1 %vm4112_vm6, %v5186_v63  ;;  %3794 = vmatpush3.bf16.msra.mxu1 %v3793_v29  ;;  %v3447_v63 = vld [vmem:[%s5150_s17] ss:$0 sm:$0xff] }
 0x675   : > { %v3760_v55 = vpop.f32.mrb[28].mxu1 }
 0x676   : > { %v3026_v37 = vadd.f32 %v3760_v55, %v3447_v63  ;;  %v3017_v59 = vpop.f32.mrb[29].mxu1 }
 0x677   : > { %v3018_v12 = vadd.f32 %v3447_v63, %v3017_v59  ;;  %v3761_v53 = vpop.f32.mrb[30].mxu1 }
 0x678   : > { %v3455_v33 = vmul.f32 -1.442695, %v3026_v37  ;;  %v3029_v39 = vadd.f32 %v3761_v53, %v3447_v63  ;;  %v3020_v24 = vpop.f32.mrb[31].mxu1 }
 0x679   : > { %v3453_v43 = vmul.f32 -1.442695, %v3018_v12  ;;  %v3021_v13 = vadd.f32 %v3447_v63, %v3020_v24 }
 0x67a   : > { %4014 = vpow2.f32 %v3455_v33  ;;  %v3456_v6 = vmul.f32 -1.442695, %v3029_v39 }
 0x67b   : > { %4016 = vpow2.f32 %v3453_v43  ;;  %v3454_v48 = vmul.f32 -1.442695, %v3021_v13 }
 0x67c   : > { %4018 = vpow2.f32 %v3456_v6 }
 0x67d   : > { %4020 = vpow2.f32 %v3454_v48  ;;  %v3764_v57 = vpop.f32.mrb[32].mxu1 }
 0x67e   : > { %v3042_v2 = vadd.f32 %v3764_v57, %v3447_v63  ;;  %v3033_v22 = vpop.f32.mrb[33].mxu1 }
 0x67f   : > { %v3034_v32 = vadd.f32 %v3447_v63, %v3033_v22  ;;  %v3765_v0 = vpop.f32.mrb[34].mxu1  ;;  %v3131_v22 = vld [vmem:[%s5152_s19] sm:$0x1] }
 0x680   : > { %v3459_v26 = vmul.f32 -1.442695, %v3042_v2  ;;  %v3045_v35 = vadd.f32 %v3765_v0, %v3447_v63  ;;  %v3036_v38 = vpop.f32.mrb[35].mxu1 }
 0x681   : > { %v3457_v60 = vmul.f32 -1.442695, %v3034_v32  ;;  %v3037_v27 = vadd.f32 %v3447_v63, %v3036_v38 }
 0x682   : > { %4022 = vpow2.f32 %v3459_v26  ;;  %v3460_v8 = vmul.f32 -1.442695, %v3045_v35 }
 0x683   : > { %4024 = vpow2.f32 %v3457_v60  ;;  %v3458_v25 = vmul.f32 -1.442695, %v3037_v27 }
 0x684   : > { %v4015_v16 = vpop.eup %4014  ;;  %4026 = vpow2.f32 %v3460_v8 }
 0x685   : > { %v4017_v36 = vpop.eup %4016  ;;  %v3074_v21 = vadd.f32 1.0, %v4015_v16  ;;  %4028 = vpow2.f32 %v3458_v25 }
 0x686   : > { %v4019_v47 = vpop.eup %4018  ;;  %v3072_v11 = vadd.f32 1.0, %v4017_v36 }
 0x687   : > { %v4021_v7 = vpop.eup %4020  ;;  %4030 = vrcp.f32 %v3074_v21  ;;  %v3075_v4 = vadd.f32 1.0, %v4019_v47 }
 0x688   : > { %4032 = vrcp.f32 %v3072_v11  ;;  %v3073_v1 = vadd.f32 1.0, %v4021_v7 }
 0x689   : > { %4034 = vrcp.f32 %v3075_v4 }
 0x68a   : > { %4036 = vrcp.f32 %v3073_v1 }
 0x68c   : > { %v4023_v17 = vpop.eup %4022 }
 0x68d   : > { %v4025_v58 = vpop.eup %4024  ;;  %v3078_v61 = vadd.f32 1.0, %v4023_v17 }
 0x68e   : > { %v4027_v40 = vpop.eup %4026  ;;  %v3076_v18 = vadd.f32 1.0, %v4025_v58 }
 0x68f   : > { %v4029_v14 = vpop.eup %4028  ;;  %4038 = vrcp.f32 %v3078_v61  ;;  %v3079_v9 = vadd.f32 1.0, %v4027_v40 }
 0x690   : > { %4040 = vrcp.f32 %v3076_v18  ;;  %v3077_v34 = vadd.f32 1.0, %v4029_v14 }
 0x691   : > { %v4031_v50 = vpop.eup %4030  ;;  %4042 = vrcp.f32 %v3079_v9 }
 0x692   : > { %v4033_v20 = vpop.eup %4032  ;;  %4044 = vrcp.f32 %v3077_v34  ;;  %v3098_v56 = vmul.f32 %v4031_v50, %v3026_v37 }
 0x693   : > { %v4035_v46 = vpop.eup %4034  ;;  %v3096_v3 = vmul.f32 %v4033_v20, %v3018_v12 }
 0x694   : > { %v4037_v28 = vpop.eup %4036  ;;  %v3099_v51 = vmul.f32 %v4035_v46, %v3029_v39  ;;  %v3108_v10 = vsel %vm3104_vm9, %v3098_v56, 0.0 }
 0x695   : > { %v3097_v19 = vmul.f32 %v4037_v28, %v3021_v13  ;;  %v3105_v41 = vsel %vm3104_vm9, %v3096_v3, 0.0 }
 0x696   : > { %v3110_v15 = vsel %vm3104_vm9, %v3099_v51, 0.0 }
 0x697   : > { %v3106_v62 = vsel %vm3104_vm9, %v3097_v19, 0.0 }
 0x698   : > { %v3107_v31 = vadd.f32 %v3106_v62, %v3105_v41 }
 0x699   : > { %v4039_v30 = vpop.eup %4038 }
 0x69a   : > { %v4041_v5 = vpop.eup %4040  ;;  %v3109_v23 = vadd.f32 %v3108_v10, %v3107_v31  ;;  %v3102_v44 = vmul.f32 %v4039_v30, %v3042_v2 }
 0x69b   : > { %v4043_v45 = vpop.eup %4042  ;;  %v3100_v54 = vmul.f32 %v4041_v5, %v3034_v32 }
 0x69c   : > { %v4045_v49 = vpop.eup %4044  ;;  %v3111_v42 = vadd.f32 %v3110_v15, %v3109_v23  ;;  %v3103_v55 = vmul.f32 %v4043_v45, %v3045_v35  ;;  %v3116_v12 = vsel %vm3104_vm9, %v3102_v44, 0.0 }
 0x69d   : > { %v3112_v52 = vsel %vm3104_vm9, %v3100_v54, 0.0  ;;  %v3101_v29 = vmul.f32 %v4045_v49, %v3037_v27 }
 0x69e   : > { %v3113_v63 = vadd.f32 %v3112_v52, %v3111_v42  ;;  %v3118_v33 = vsel %vm3104_vm9, %v3103_v55, 0.0 }
 0x69f   : > { %v3114_v37 = vsel %vm3104_vm9, %v3101_v29, 0.0 }
 0x6a0   : > { %v3115_v59 = vadd.f32 %v3114_v37, %v3113_v63 }
 0x6a2   : > { %v3117_v53 = vadd.f32 %v3116_v12, %v3115_v59 }
 0x6a4   : > { %v3119_v39 = vadd.f32 %v3118_v33, %v3117_v53 }
 0x6a6   : > { %v3120_v24 = vrot.slane %v3119_v39, 4 }
 0x6a8   : > { %v3121_v43 = vadd.f32 %v3120_v24, %v3119_v39 }
 0x6aa   : > { %v3122_v13 = vrot.slane %v3121_v43, 2 }
 0x6ac   : > { %v3123_v6 = vadd.f32 %v3122_v13, %v3121_v43 }
 0x6ae   : > { %v3124_v48 = vrot.slane %v3123_v6, 1 }
 0x6b0   : > { %v3125_v57 = vadd.f32 %v3124_v48, %v3123_v6 }
 0x6b2   : > { %v3126_v2 = vmul.f32 0.015625, %v3125_v57 }
 0x6b4   : > { %3775 = vmatmul.mubr.msk.f32.vlgmr.msra.gmra.mrb[36].mxu1 %vm3104_vm9, %v3126_v2 }
 0x787   : > { %v3201_v32 = vpop.f32.mrb[36].mxu1 }
 0x788   : > { %v3202_v0 = vadd.f32 %v3201_v32, %v3131_v22  ;;  %v3776_v26 = vpop.f32.mrb[37].mxu1 }
 0x78a   : > { %3206 = vst.msk [vmem:[%s666_s20] sm:$0x1] %vm3205_vm10, %v3202_v0 }
 0x78b   : > { %4059 = shalt.err (!%p4056_p3)
}
 0x78c   : > { %s4060_s3 = scalar_lea.hbm %s5091_s0, 16  ;;  %s4064_s29 = scalar_lea.hbm %s5189_s30, 32 }
 0x78d   : > { %p4061_p4 = scmp.ne.s32.totalorder %s5091_s0, %s4060_s3  ;;  %p4065_p9 = scmp.lt.u32.totalorder %s5091_s0, %s5189_s30 }
 0x78e   : > { %p4066_p10 = scmp.lt.u32.totalorder %s4064_s29, %s4060_s3  ;;  %p4068_p12 = scmp.lt.u32.totalorder %s4060_s3, %s5091_s0 }
 0x78f   : > { %p4062_p7 = pnand %p4061_p4, %p4257_p5 }
 0x790   : > { %p4067_p11 = por %p4066_p10, %p4065_p9 }
 0x791   : > { %p4063_p8 = pneg %p4062_p7 }
 0x792   : > { %p4069_p13 = por %p4068_p12, %p4067_p11 }
 0x794   : > { %p4070_p0 = pnand %p4069_p13, %p4063_p8 }
 0x796   : > { %4073 = shalt.err (!%p4070_p0)
}
 0x797   : > { %3862 = dma.vmem_to_hbm [thread:$0]  (%p4257_p5), %s5093_s24, 16, %s5091_s0, %s3208_s25  }
 0x798 PF: > { %s5190_s28 = sld [smem:[#allocation8_spill]]  ;;  %s5191_s26 = sld [smem:[#allocation6_spill]] }
 0x79e   : > { %p3868_p1 = scmp.ge.s32.totalorder %s5190_s28, 2  ;;  %s3232_s1 = sand.u32 1, %s5191_s26  }
 0x79f   : > { %s3233_s20 = scalar_lea.sflag [#allocation4], %s3232_s1 }
 0x7a0   : > { %p3865_p2 = pnand %p3868_p1, %p4261_p6 }
 0x7a2   : > { %4091 = dma.done.wait (!%p3865_p2), %s3233_s20, 16  }
 0x7a3   : > { %4093 = vsyncadd (!%p3865_p2), %s3233_s20, 4294967280  ;;  %s5193_s24 = sld [smem:[#allocation9_spill]]  ;;  %s5194_s3 = sld [smem:[#allocation7_spill]] }
 0x7a4   : > { %s5195_s23 = sld [smem:[#allocation10_spill]]  ;;  %s5196_s1 = smov %s4100_s22 }
 0x7a9   : > { %p30_p3 = scmp.ge.s32.totalorder %s5193_s24, 4   ;;  %s5197_s22 = smov %s5194_s3 }
 0x7ab   :  { %32 = sbr.rel (!%p30_p3) target bundleno = 10 (0xa), region = 146 }
 0x7b2   :  { %3237 = vsyncpa [#allocation4], 1 }
 0x7b3   :  { %3239 = vsyncpa [#allocation4 + $0x1], 1 }

</bundles_post_ra>
